<compile_context>
chip_gen: v5e
topology: v5e:2x2
jax: 0.10.0
libtpu: 0.0.40
codegen_flags: <defaults>
</compile_context>

<pallas_src>
import jax
import jax.numpy as jnp
from jax import lax
from jax.experimental import pallas as pl
from jax.experimental.pallas import tpu as pltpu

LN_EPS = 1e-12


def _bert_embed_kernel(ids_ref,          # SMEM scalar prefetch: (B*S,) int32 word ids
                       word_hbm,         # ANY:  (V, H) word-embedding table (stays in HBM)
                       pos_ref,          # VMEM: (T, H) position rows for this tile
                       tt_ref,           # VMEM: (1, 1, T, 1) int32 token-type ids
                       type_ref,         # VMEM: (TV, H) token-type table (resident)
                       g_ref, bta_ref,   # VMEM: (1, H) LayerNorm gamma / beta
                       o_ref,            # VMEM: (1, T, H) output tile
                       wbuf, sem):       # scratch: VMEM (2, T, H), DMA sem (2,)
    b = pl.program_id(0)
    s = pl.program_id(1)
    n_s = pl.num_programs(1)
    T = o_ref.shape[1]
    H = o_ref.shape[2]
    S = n_s * T

    def start_gather(s_idx, slot):
        base = b * S + s_idx * T

        @pl.loop(0, T)
        def _(k):
            row = ids_ref[base + k]
            pltpu.make_async_copy(
                word_hbm.at[pl.ds(row, 1), :],
                wbuf.at[slot, pl.ds(k, 1), :],
                sem.at[slot]).start()

    def wait_gather(slot):
        @pl.loop(0, T)
        def _(k):
            # Dummy src of the same size: wait only needs size + semaphore.
            pltpu.make_async_copy(
                word_hbm.at[pl.ds(0, 1), :],
                wbuf.at[slot, pl.ds(k, 1), :],
                sem.at[slot]).wait()

    slot = s % 2

    # Prime the double buffer at the start of each batch row (inner axis).
    @pl.when(s == 0)
    def _():
        start_gather(0, 0)

    # Prefetch the next tile's word rows while we LayerNorm the current one.
    @pl.when(s + 1 < n_s)
    def _():
        start_gather(s + 1, 1 - slot)

    wait_gather(slot)

    # ---- sum embeddings + LayerNorm (f32 math) ----
    w = wbuf[slot].astype(jnp.float32)                  # (T, H)
    p = pos_ref[...].astype(jnp.float32)                # (T, H)
    tt = tt_ref[0, 0]                                   # (T, 1) int32
    type_tab = type_ref[...].astype(jnp.float32)        # (TV, H)

    t_sel = jnp.zeros((T, H), jnp.float32)
    for v in range(type_ref.shape[0]):                  # static, tiny (=2)
        t_sel = jnp.where(tt == v, type_tab[v:v + 1, :], t_sel)

    x = w + p + t_sel
    mean = jnp.mean(x, axis=-1, keepdims=True)
    xc = x - mean
    var = jnp.mean(xc * xc, axis=-1, keepdims=True)
    inv = lax.rsqrt(var + LN_EPS)
    y = xc * inv * g_ref[...].astype(jnp.float32) + bta_ref[...].astype(jnp.float32)

    # Dropout(p=0.1) is the identity at inference time.
    # TODO(synk): training-mode dropout would need pltpu.prng_seed/prng_random_bits
    # (cannot be bit-exact with PyTorch RNG).
    o_ref[0, :, :] = y.astype(o_ref.dtype)


def bert_embeddings(input_ids, token_type_ids, word_emb, pos_emb, type_emb,
                    gamma, beta, *, tile_tokens=None):
    B, S = input_ids.shape
    V, H = word_emb.shape
    P = pos_emb.shape[0]
    TV = type_emb.shape[0]
    assert S <= P, "sequence longer than position table"
    assert H % 128 == 0, "hidden size must be a multiple of 128 (lane axis)"

    if tile_tokens is None:
        tile_tokens = 256
        while S % tile_tokens:
            tile_tokens //= 2
    T = tile_tokens
    assert S % T == 0 and T % 8 == 0, "token tile must divide S and be a multiple of 8"
    n_s = S // T

    if token_type_ids is None:
        token_type_ids = jnp.zeros_like(input_ids)

    # Clamp word ids so a bad id can never drive an out-of-bounds DMA.
    ids_flat = jnp.clip(input_ids.reshape(-1).astype(jnp.int32), 0, V - 1)
    tt4 = token_type_ids.astype(jnp.int32).reshape(B, n_s, T, 1)
    gamma2 = gamma.reshape(1, H)
    beta2 = beta.reshape(1, H)

    out = pl.pallas_call(
        _bert_embed_kernel,
        out_shape=jax.ShapeDtypeStruct((B, S, H), word_emb.dtype),
        grid_spec=pltpu.PrefetchScalarGridSpec(
            num_scalar_prefetch=1,
            grid=(B, n_s),
            in_specs=[
                pl.BlockSpec(memory_space=pl.ANY),                           # word table (HBM)
                pl.BlockSpec((T, H), lambda b, s, ids: (s, 0)),              # position rows
                pl.BlockSpec((1, 1, T, 1), lambda b, s, ids: (b, s, 0, 0)),  # token-type ids
                pl.BlockSpec((TV, H), lambda b, s, ids: (0, 0)),             # token-type table
                pl.BlockSpec((1, H), lambda b, s, ids: (0, 0)),              # gamma
                pl.BlockSpec((1, H), lambda b, s, ids: (0, 0)),              # beta
            ],
            out_specs=pl.BlockSpec((1, T, H), lambda b, s, ids: (b, s, 0)),
            scratch_shapes=[
                pltpu.VMEM((2, T, H), word_emb.dtype),   # double-buffered word-row gather
                pltpu.SemaphoreType.DMA((2,)),           # one DMA sem per slot
            ],
        ),
        compiler_params=pltpu.CompilerParams(
            dimension_semantics=("parallel", "arbitrary")),
    )(ids_flat, word_emb, pos_emb, tt4, type_emb, gamma2, beta2)
    return out


def _reference(input_ids, token_type_ids, word_emb, pos_emb, type_emb, gamma, beta):
    B, S = input_ids.shape
    pos_ids = jnp.broadcast_to(jnp.arange(S, dtype=jnp.int32), (B, S))
    x = (jnp.take(word_emb, input_ids, axis=0)
         + jnp.take(pos_emb, pos_ids, axis=0)
         + jnp.take(type_emb, token_type_ids, axis=0)).astype(jnp.float32)
    mean = jnp.mean(x, axis=-1, keepdims=True)
    var = jnp.mean((x - mean) ** 2, axis=-1, keepdims=True)
    y = (x - mean) * lax.rsqrt(var + LN_EPS) * gamma + beta
    return y.astype(word_emb.dtype)


if __name__ == "__main__":
    # Small shapes consistent with the module (hidden = 256 as in the spec;
    # smaller vocab for a quick test — same code path as 30522).
    B, S = 2, 256
    hidden_size = 256
    vocab_size = 1000
    max_position_embeddings = 512
    type_vocab_size = 2

    key = jax.random.PRNGKey(0)
    k_w, k_p, k_t, k_g, k_b, k_ids, k_tt = jax.random.split(key, 7)

    word_emb = jax.random.normal(k_w, (vocab_size, hidden_size), jnp.float32)
    pos_emb = jax.random.normal(k_p, (max_position_embeddings, hidden_size), jnp.float32)
    type_emb = jax.random.normal(k_t, (type_vocab_size, hidden_size), jnp.float32)
    gamma = 1.0 + 0.1 * jax.random.normal(k_g, (hidden_size,), jnp.float32)
    beta = 0.1 * jax.random.normal(k_b, (hidden_size,), jnp.float32)

    input_ids = jax.random.randint(k_ids, (B, S), 0, vocab_size, dtype=jnp.int32)
    token_type_ids = jax.random.randint(k_tt, (B, S), 0, type_vocab_size, dtype=jnp.int32)

    # tile_tokens=128 -> 2 sequence tiles per batch row, exercising both the
    # priming and the prefetch path of the double-buffered word gather.
    out = bert_embeddings(input_ids, token_type_ids, word_emb, pos_emb,
                          type_emb, gamma, beta, tile_tokens=128)
    out = jax.block_until_ready(out)

    ref = _reference(input_ids, token_type_ids, word_emb, pos_emb, type_emb,
                     gamma, beta)
    assert out.shape == (B, S, hidden_size)
    assert jnp.allclose(out, ref, atol=1e-4, rtol=1e-4), \
        float(jnp.max(jnp.abs(out - ref)))

    print("KERNEL_OK")
</pallas_src>

<mosaic_0001>
module attributes {stable_mosaic.version = 11 : i64} {
  func.func @_bert_embed_kernel(%arg0: i32, %arg1: i32, %arg2: memref<512xi32, #tpu.memory_space<smem>>, %arg3: memref<1000x256xf32, #tpu.memory_space<any>>, %arg4: memref<128x256xf32, #tpu.memory_space<vmem>>, %arg5: memref<1x1x128x1xi32, #tpu.memory_space<vmem>>, %arg6: memref<2x256xf32, #tpu.memory_space<vmem>>, %arg7: memref<1x256xf32, #tpu.memory_space<vmem>>, %arg8: memref<1x256xf32, #tpu.memory_space<vmem>>, %arg9: memref<1x128x256xf32, #tpu.memory_space<vmem>>, %arg10: memref<2x128x256xf32, #tpu.memory_space<vmem>>, %arg11: memref<2x!tpu.dma_semaphore, #tpu.memory_space<semaphore_mem>>) attributes {dimension_semantics = [#tpu.dimension_semantics<parallel>, #tpu.dimension_semantics<arbitrary>], iteration_bounds = array<i64: 2, 2>, scalar_prefetch = 1 : i64, scratch_operands = 2 : i64, tpu.core_type = #tpu.core_type<tc>, window_params = [{}, {transform_indices = @transform_1, window_bounds = array<i64: 128, 256>}, {transform_indices = @transform_2, window_bounds = array<i64: 1, 1, 128, 1>}, {pipeline_mode = #tpu.pipeline_mode<synchronous>, transform_indices = @transform_3, window_bounds = array<i64: 2, 256>}, {pipeline_mode = #tpu.pipeline_mode<synchronous>, transform_indices = @transform_4, window_bounds = array<i64: 1, 256>}, {pipeline_mode = #tpu.pipeline_mode<synchronous>, transform_indices = @transform_5, window_bounds = array<i64: 1, 256>}, {transform_indices = @transform_6, window_bounds = array<i64: 1, 128, 256>}]} {
    %c2_i32 = arith.constant 2 : i32
    %c0_i32 = arith.constant 0 : i32
    %0 = arith.cmpi eq, %c2_i32, %c0_i32 : i32
    %c1_i32 = arith.constant 1 : i32
    %1 = arith.select %0, %c1_i32, %c2_i32 : i32
    %2 = arith.remsi %arg1, %1 : i32
    %c0_i32_0 = arith.constant 0 : i32
    %3 = arith.cmpi ne, %2, %c0_i32_0 : i32
    %c0_i32_1 = arith.constant 0 : i32
    %4 = arith.cmpi slt, %2, %c0_i32_1 : i32
    %c0_i32_2 = arith.constant 0 : i32
    %5 = arith.cmpi slt, %1, %c0_i32_2 : i32
    %6 = arith.xori %4, %5 : i1
    %7 = arith.andi %6, %3 : i1
    %8 = arith.addi %2, %1 : i32
    %9 = arith.select %7, %8, %2 : i32
    %c0_i32_3 = arith.constant 0 : i32
    %10 = arith.cmpi eq, %arg1, %c0_i32_3 : i32
    %11 = arith.extui %10 : i1 to i32
    %c0_i32_4 = arith.constant 0 : i32
    %12 = arith.cmpi ne, %11, %c0_i32_4 : i32
    scf.if %12 {
      %c256_i32 = arith.constant 256 : i32
      %69 = arith.muli %arg0, %c256_i32 : i32
      %c0_i32_34 = arith.constant 0 : i32
      %70 = arith.addi %69, %c0_i32_34 : i32
      %c0_i32_35 = arith.constant 0 : i32
      %c128_i32_36 = arith.constant 128 : i32
      %71 = arith.addi %c0_i32_35, %c128_i32_36 : i32
      %c1_i32_37 = arith.constant 1 : i32
      scf.for %arg12 = %c0_i32_35 to %71 step %c1_i32_37  : i32 {
        %c1_i32_39 = arith.constant 1 : i32
        %72 = arith.muli %arg12, %c1_i32_39 : i32
        %c0_i32_40 = arith.constant 0 : i32
        %73 = arith.addi %c0_i32_40, %72 : i32
        %74 = arith.addi %70, %73 : i32
        %75 = arith.index_cast %74 : i32 to index
        %76 = memref.load %arg2[%75] : memref<512xi32, #tpu.memory_space<smem>>
        %c0_i32_41 = arith.constant 0 : i32
        %c0_i32_42 = arith.constant 0 : i32
        %c0_i32_43 = arith.constant 0 : i32
        %77 = tpu.memref_slice %arg3[%76, %c0_i32_43] : memref<1000x256xf32, #tpu.memory_space<any>> -> memref<1x256xf32, #tpu.memory_space<any>>
        %c0_i32_44 = arith.constant 0 : i32
        %78 = tpu.memref_slice %arg10[%c0_i32_41, %73, %c0_i32_44] : memref<2x128x256xf32, #tpu.memory_space<vmem>> -> memref<1x1x256xf32, #tpu.memory_space<vmem>>
        %79 = tpu.memref_squeeze %78 : memref<1x1x256xf32, #tpu.memory_space<vmem>> -> memref<1x256xf32, #tpu.memory_space<vmem>>
        %80 = tpu.memref_slice %arg11[%c0_i32_42] : memref<2x!tpu.dma_semaphore, #tpu.memory_space<semaphore_mem>> -> memref<1x!tpu.dma_semaphore, #tpu.memory_space<semaphore_mem>>
        %81 = tpu.memref_squeeze %80 : memref<1x!tpu.dma_semaphore, #tpu.memory_space<semaphore_mem>> -> memref<!tpu.dma_semaphore, #tpu.memory_space<semaphore_mem>>
        tpu.enqueue_dma source(%77 : memref<1x256xf32, #tpu.memory_space<any>>) target(%79 : memref<1x256xf32, #tpu.memory_space<vmem>>) target_semaphore(%81 : memref<!tpu.dma_semaphore, #tpu.memory_space<semaphore_mem>>)
      }
      %c128_i32_38 = arith.constant 128 : i32
    } else {
    }
    %c1_i32_5 = arith.constant 1 : i32
    %13 = arith.addi %arg1, %c1_i32_5 : i32
    %c2_i32_6 = arith.constant 2 : i32
    %14 = arith.cmpi slt, %13, %c2_i32_6 : i32
    %15 = arith.extui %14 : i1 to i32
    %c0_i32_7 = arith.constant 0 : i32
    %16 = arith.cmpi ne, %15, %c0_i32_7 : i32
    scf.if %16 {
      %c1_i32_34 = arith.constant 1 : i32
      %69 = arith.addi %arg1, %c1_i32_34 : i32
      %c1_i32_35 = arith.constant 1 : i32
      %70 = arith.subi %c1_i32_35, %9 : i32
      %c256_i32 = arith.constant 256 : i32
      %71 = arith.muli %arg0, %c256_i32 : i32
      %c128_i32_36 = arith.constant 128 : i32
      %72 = arith.muli %69, %c128_i32_36 : i32
      %73 = arith.addi %71, %72 : i32
      %c0_i32_37 = arith.constant 0 : i32
      %c128_i32_38 = arith.constant 128 : i32
      %74 = arith.addi %c0_i32_37, %c128_i32_38 : i32
      %c1_i32_39 = arith.constant 1 : i32
      scf.for %arg12 = %c0_i32_37 to %74 step %c1_i32_39  : i32 {
        %c1_i32_41 = arith.constant 1 : i32
        %75 = arith.muli %arg12, %c1_i32_41 : i32
        %c0_i32_42 = arith.constant 0 : i32
        %76 = arith.addi %c0_i32_42, %75 : i32
        %77 = arith.addi %73, %76 : i32
        %78 = arith.index_cast %77 : i32 to index
        %79 = memref.load %arg2[%78] : memref<512xi32, #tpu.memory_space<smem>>
        %c0_i32_43 = arith.constant 0 : i32
        %80 = tpu.memref_slice %arg3[%79, %c0_i32_43] : memref<1000x256xf32, #tpu.memory_space<any>> -> memref<1x256xf32, #tpu.memory_space<any>>
        %c0_i32_44 = arith.constant 0 : i32
        %81 = tpu.memref_slice %arg10[%70, %76, %c0_i32_44] : memref<2x128x256xf32, #tpu.memory_space<vmem>> -> memref<1x1x256xf32, #tpu.memory_space<vmem>>
        %82 = tpu.memref_squeeze %81 : memref<1x1x256xf32, #tpu.memory_space<vmem>> -> memref<1x256xf32, #tpu.memory_space<vmem>>
        %83 = tpu.memref_slice %arg11[%70] : memref<2x!tpu.dma_semaphore, #tpu.memory_space<semaphore_mem>> -> memref<1x!tpu.dma_semaphore, #tpu.memory_space<semaphore_mem>>
        %84 = tpu.memref_squeeze %83 : memref<1x!tpu.dma_semaphore, #tpu.memory_space<semaphore_mem>> -> memref<!tpu.dma_semaphore, #tpu.memory_space<semaphore_mem>>
        tpu.enqueue_dma source(%80 : memref<1x256xf32, #tpu.memory_space<any>>) target(%82 : memref<1x256xf32, #tpu.memory_space<vmem>>) target_semaphore(%84 : memref<!tpu.dma_semaphore, #tpu.memory_space<semaphore_mem>>)
      }
      %c128_i32_40 = arith.constant 128 : i32
    } else {
    }
    %c0_i32_8 = arith.constant 0 : i32
    %c128_i32 = arith.constant 128 : i32
    %17 = arith.addi %c0_i32_8, %c128_i32 : i32
    %c1_i32_9 = arith.constant 1 : i32
    scf.for %arg12 = %c0_i32_8 to %17 step %c1_i32_9  : i32 {
      %c1_i32_34 = arith.constant 1 : i32
      %69 = arith.muli %arg12, %c1_i32_34 : i32
      %c0_i32_35 = arith.constant 0 : i32
      %70 = arith.addi %c0_i32_35, %69 : i32
      %c0_i32_36 = arith.constant 0 : i32
      %c0_i32_37 = arith.constant 0 : i32
      %71 = tpu.memref_slice %arg3[%c0_i32_36, %c0_i32_37] : memref<1000x256xf32, #tpu.memory_space<any>> -> memref<1x256xf32, #tpu.memory_space<any>>
      %c0_i32_38 = arith.constant 0 : i32
      %72 = tpu.memref_slice %arg10[%9, %70, %c0_i32_38] : memref<2x128x256xf32, #tpu.memory_space<vmem>> -> memref<1x1x256xf32, #tpu.memory_space<vmem>>
      %73 = tpu.memref_squeeze %72 : memref<1x1x256xf32, #tpu.memory_space<vmem>> -> memref<1x256xf32, #tpu.memory_space<vmem>>
      %74 = tpu.memref_slice %arg11[%9] : memref<2x!tpu.dma_semaphore, #tpu.memory_space<semaphore_mem>> -> memref<1x!tpu.dma_semaphore, #tpu.memory_space<semaphore_mem>>
      %75 = tpu.memref_squeeze %74 : memref<1x!tpu.dma_semaphore, #tpu.memory_space<semaphore_mem>> -> memref<!tpu.dma_semaphore, #tpu.memory_space<semaphore_mem>>
      tpu.wait_dma2 semaphore(%75 : memref<!tpu.dma_semaphore, #tpu.memory_space<semaphore_mem>>) src(%71 : memref<1x256xf32, #tpu.memory_space<any>>) dst(%73 : memref<1x256xf32, #tpu.memory_space<vmem>>)
    }
    %c128_i32_10 = arith.constant 128 : i32
    %18 = arith.index_cast %9 : i32 to index
    %c0 = arith.constant 0 : index
    %c0_11 = arith.constant 0 : index
    %19 = vector.load %arg10[%18, %c0, %c0_11] : memref<2x128x256xf32, #tpu.memory_space<vmem>>, vector<1x128x256xf32>
    %20 = vector.shape_cast %19 : vector<1x128x256xf32> to vector<128x256xf32>
    %c0_12 = arith.constant 0 : index
    %c0_13 = arith.constant 0 : index
    %21 = vector.load %arg4[%c0_12, %c0_13] : memref<128x256xf32, #tpu.memory_space<vmem>>, vector<128x256xf32>
    %c0_14 = arith.constant 0 : index
    %c0_15 = arith.constant 0 : index
    %c0_16 = arith.constant 0 : index
    %c0_17 = arith.constant 0 : index
    %22 = vector.load %arg5[%c0_14, %c0_15, %c0_16, %c0_17] : memref<1x1x128x1xi32, #tpu.memory_space<vmem>>, vector<1x1x128x1xi32>
    %23 = vector.shape_cast %22 : vector<1x1x128x1xi32> to vector<128x1xi32>
    %c0_18 = arith.constant 0 : index
    %c0_19 = arith.constant 0 : index
    %24 = vector.load %arg6[%c0_18, %c0_19] : memref<2x256xf32, #tpu.memory_space<vmem>>, vector<2x256xf32>
    %cst = arith.constant 0.000000e+00 : f32
    %25 = vector.broadcast %cst : f32 to vector<128x256xf32>
    %c0_i32_20 = arith.constant 0 : i32
    %26 = vector.broadcast %c0_i32_20 : i32 to vector<128x1xi32>
    %27 = arith.cmpi eq, %23, %26 : vector<128x1xi32>
    %28 = vector.extract_strided_slice %24 {offsets = [0, 0], sizes = [1, 256], strides = [1, 1]} : vector<2x256xf32> to vector<1x256xf32>
    %29 = vector.shape_cast %27 : vector<128x1xi1> to vector<128x1xi1>
    %30 = vector.broadcast %29 : vector<128x1xi1> to vector<128x256xi1>
    %31 = vector.shape_cast %28 : vector<1x256xf32> to vector<1x256xf32>
    %32 = vector.broadcast %31 : vector<1x256xf32> to vector<128x256xf32>
    %33 = arith.select %30, %32, %25 : vector<128x256xi1>, vector<128x256xf32>
    %c1_i32_21 = arith.constant 1 : i32
    %34 = vector.broadcast %c1_i32_21 : i32 to vector<128x1xi32>
    %35 = arith.cmpi eq, %23, %34 : vector<128x1xi32>
    %36 = vector.extract_strided_slice %24 {offsets = [1, 0], sizes = [1, 256], strides = [1, 1]} : vector<2x256xf32> to vector<1x256xf32>
    %37 = vector.shape_cast %35 : vector<128x1xi1> to vector<128x1xi1>
    %38 = vector.broadcast %37 : vector<128x1xi1> to vector<128x256xi1>
    %39 = vector.shape_cast %36 : vector<1x256xf32> to vector<1x256xf32>
    %40 = vector.broadcast %39 : vector<1x256xf32> to vector<128x256xf32>
    %41 = arith.select %38, %40, %33 : vector<128x256xi1>, vector<128x256xf32>
    %42 = arith.addf %20, %21 : vector<128x256xf32>
    %43 = arith.addf %42, %41 : vector<128x256xf32>
    %cst_22 = arith.constant dense<0.000000e+00> : vector<128xf32>
    %44 = vector.multi_reduction <add>, %43, %cst_22 [1] : vector<128x256xf32> to vector<128xf32>
    %45 = vector.shape_cast %44 : vector<128xf32> to vector<128x1xf32>
    %cst_23 = arith.constant 2.560000e+02 : f32
    %46 = vector.broadcast %cst_23 : f32 to vector<128x1xf32>
    %47 = arith.divf %45, %46 : vector<128x1xf32>
    %48 = vector.broadcast %47 : vector<128x1xf32> to vector<128x256xf32>
    %49 = arith.subf %43, %48 : vector<128x256xf32>
    %50 = arith.mulf %49, %49 : vector<128x256xf32>
    %cst_24 = arith.constant dense<0.000000e+00> : vector<128xf32>
    %51 = vector.multi_reduction <add>, %50, %cst_24 [1] : vector<128x256xf32> to vector<128xf32>
    %52 = vector.shape_cast %51 : vector<128xf32> to vector<128x1xf32>
    %cst_25 = arith.constant 2.560000e+02 : f32
    %53 = vector.broadcast %cst_25 : f32 to vector<128x1xf32>
    %54 = arith.divf %52, %53 : vector<128x1xf32>
    %cst_26 = arith.constant 9.99999996E-13 : f32
    %55 = vector.broadcast %cst_26 : f32 to vector<128x1xf32>
    %56 = arith.addf %54, %55 : vector<128x1xf32>
    %57 = math.rsqrt %56 : vector<128x1xf32>
    %58 = vector.broadcast %57 : vector<128x1xf32> to vector<128x256xf32>
    %59 = arith.mulf %49, %58 : vector<128x256xf32>
    %c0_27 = arith.constant 0 : index
    %c0_28 = arith.constant 0 : index
    %60 = vector.load %arg7[%c0_27, %c0_28] : memref<1x256xf32, #tpu.memory_space<vmem>>, vector<1x256xf32>
    %61 = vector.broadcast %60 : vector<1x256xf32> to vector<128x256xf32>
    %62 = arith.mulf %59, %61 : vector<128x256xf32>
    %c0_29 = arith.constant 0 : index
    %c0_30 = arith.constant 0 : index
    %63 = vector.load %arg8[%c0_29, %c0_30] : memref<1x256xf32, #tpu.memory_space<vmem>>, vector<1x256xf32>
    %64 = vector.broadcast %63 : vector<1x256xf32> to vector<128x256xf32>
    %65 = arith.addf %62, %64 : vector<128x256xf32>
    %c0_31 = arith.constant 0 : index
    %c0_32 = arith.constant 0 : index
    %c0_33 = arith.constant 0 : index
    %66 = vector.load %arg9[%c0_31, %c0_32, %c0_33] : memref<1x128x256xf32, #tpu.memory_space<vmem>>, vector<1x128x256xf32>
    %67 = vector.shape_cast %66 : vector<1x128x256xf32> to vector<128x256xf32>
    %68 = vector.shape_cast %65 : vector<128x256xf32> to vector<1x128x256xf32>
    tpu.vector_store %arg9[%c0_31, %c0_32, %c0_33], %68 {strides = array<i32>} : memref<1x128x256xf32, #tpu.memory_space<vmem>>, vector<1x128x256xf32>,
    return
  }
  func.func @transform_1(%arg0: i32, %arg1: i32, %arg2: memref<512xi32, #tpu.memory_space<smem>>) -> (i32, i32) {
    %c0_i32 = arith.constant 0 : i32
    %c0_i32_0 = arith.constant 0 : i32
    return %arg1, %c0_i32 : i32, i32
  }
  func.func @transform_2(%arg0: i32, %arg1: i32, %arg2: memref<512xi32, #tpu.memory_space<smem>>) -> (i32, i32, i32, i32) {
    %c0_i32 = arith.constant 0 : i32
    %c0_i32_0 = arith.constant 0 : i32
    %c0_i32_1 = arith.constant 0 : i32
    return %arg0, %arg1, %c0_i32, %c0_i32_0 : i32, i32, i32, i32
  }
  func.func @transform_3(%arg0: i32, %arg1: i32, %arg2: memref<512xi32, #tpu.memory_space<smem>>) -> (i32, i32) {
    %c0_i32 = arith.constant 0 : i32
    %c0_i32_0 = arith.constant 0 : i32
    %c0_i32_1 = arith.constant 0 : i32
    return %c0_i32, %c0_i32_0 : i32, i32
  }
  func.func @transform_4(%arg0: i32, %arg1: i32, %arg2: memref<512xi32, #tpu.memory_space<smem>>) -> (i32, i32) {
    %c0_i32 = arith.constant 0 : i32
    %c0_i32_0 = arith.constant 0 : i32
    %c0_i32_1 = arith.constant 0 : i32
    return %c0_i32, %c0_i32_0 : i32, i32
  }
  func.func @transform_5(%arg0: i32, %arg1: i32, %arg2: memref<512xi32, #tpu.memory_space<smem>>) -> (i32, i32) {
    %c0_i32 = arith.constant 0 : i32
    %c0_i32_0 = arith.constant 0 : i32
    %c0_i32_1 = arith.constant 0 : i32
    return %c0_i32, %c0_i32_0 : i32, i32
  }
  func.func @transform_6(%arg0: i32, %arg1: i32, %arg2: memref<512xi32, #tpu.memory_space<smem>>) -> (i32, i32, i32) {
    %c0_i32 = arith.constant 0 : i32
    %c0_i32_0 = arith.constant 0 : i32
    return %arg0, %arg1, %c0_i32 : i32, i32, i32
  }
}

</mosaic_0001>

<bundles_post_ra>
// kernel: tpu_custom_call.1
= control target key start
LH: loop header
LB: loop body
LE: loop exit
PB: predicated region body
PF: predicated region fallthrough
CT: control target
= control target key end

     0   :  { %s1962_s27 = smov [#allocation5]   ;;  %s3223_s0 = inlined_call_operand.vmem [shape: s32[512], index: 0, kind: input, shape index: {}]   ;;  %s3224_s1 = inlined_call_operand.hbm [shape: f32[1000,256], index: 1, kind: input, shape index: {}]   ;;  %s3225_s2 = inlined_call_operand.hbm [shape: f32[512,256], index: 2, kind: input, shape index: {}]   ;;  %s3226_s3 = inlined_call_operand.vmem [shape: s32[2,2,128,1], index: 3, kind: input, shape index: {}]   ;;  %s3227_s4 = inlined_call_operand.vmem [shape: f32[2,256], index: 4, kind: input, shape index: {}]   ;;  %s3228_s5 = inlined_call_operand.vmem [shape: f32[1,256], index: 5, kind: input, shape index: {}]   ;;  %s3229_s6 = inlined_call_operand.vmem [shape: f32[1,256], index: 6, kind: input, shape index: {}]   ;;  %s3230_s7 = inlined_call_operand.hbm [shape: f32[2,256,256], index: 7, kind: output, shape index: {}]  }
   0x1   :  { %3246 = sst [smem:[#allocation30_spill]] %s3225_s2  ;;  %s13_s26 = sshll.u32 %s3223_s0, 4  ;;  %s14_s26 = int_to_ptr.vmem [resolvable:$true] %s13_s26 }
   0x2   :  { %3247 = sst [smem:[#allocation31_spill]] %s3226_s3 }
   0x3   :  { %16 = dma.vmem_to_smem %s14_s26, 64, %s1962_s27, [#allocation4] }
   0x4   :  { %1894 = dma.done.wait [#allocation4], 64 }
   0x5   :  { %1895 = vsyncadd [#allocation4], 4294967232 }
   0x6   :  { %19 = sfence }
   0x7   :  { %20 = vsyncpa [#allocation7], 0 }
   0x8   :  { %22 = vsyncpa [#allocation7 + $0x1], 0 }
   0x9   :  { %23 = vsyncpa [#allocation8], 0 }
   0xa   :  { %25 = vsyncpa [#allocation8 + $0x1], 0  ;;  %s2018_s28 = smov 0   ;;  %s2020_s29 = smov 0  }
   0xb   :  { %s2022_s30 = smov 0   ;;  %s2024_s8 = smov 0  }
   0xc   :  { %s2026_s9 = smov 0   ;;  %s2028_s0 = smov 0  }
   0xd   :  { %s2030_s10 = smov 0   ;;  %s2032_s11 = smov 0  }
   0xe   :  { %s2034_s12 = smov 0   ;;  %s2036_s13 = smov 0  }
   0xf   :  { %s2038_s14 = smov 0  }
  0x10 LB: > { %3248 = sst [smem:[#allocation16_spill]] %s1908_s28  ;;  %s1502_s15 = sadd.s32 4294967295, %s1948_s14   ;;  %s1948_s14 = sphi %s2038_s14, %s31_s14   ;;  %s1944_s13 = sphi %s2036_s13, %s3285_s13   ;;  %s1940_s12 = sphi %s2034_s12, %s3284_s12   ;;  %s1936_s11 = sphi %s2032_s11, %s3283_s11   ;;  %s1932_s10 = sphi %s2030_s10, %s3282_s10   ;;  %s1928_s0 = sphi %s2028_s0, %s3281_s0   ;;  %s1924_s9 = sphi %s2026_s9, %s3280_s9   ;;  %s1920_s8 = sphi %s2024_s8, %s3279_s8   ;;  %s1916_s30 = sphi %s2022_s30, %s3278_s30   ;;  %s1912_s29 = sphi %s2020_s29, %s3277_s29   ;;  %s1908_s28 = sphi %s2018_s28, %s3276_s28  }
  0x11   : > { %3249 = sst [smem:[#allocation17_spill]] %s1912_s29  ;;  %s1503_s16 = sadd.s32 4294967294, %s1948_s14  }
  0x12   : > { %3250 = sst [smem:[#allocation18_spill]] %s1916_s30  ;;  %s40_s17 = sadd.s32 1, %s1940_s12 }
  0x13   : > { %3251 = sst [smem:[#allocation19_spill]] %s1924_s9  ;;  %s43_s18 = sadd.s32 1, %s1944_s13 }
  0x14   : > { %3252 = sst [smem:[#allocation20_spill]] %s1928_s0  ;;  %p41_p0 = scmp.ge.s32.totalorder %s40_s17, 2 }
  0x15   : > { %3253 = sst [smem:[#allocation21_spill]] %s1940_s12  ;;  %s50_s19 = sadd.s32 1, %s1928_s0 }
  0x16   : > { %3254 = sst [smem:[#allocation22_spill]] %s1944_s13  ;;  %p57_p1 = scmp.ne.s32.totalorder %s1928_s0, %s1924_s9 }
  0x17   : > { %3255 = sst [smem:[#allocation23_spill]] %s1948_s14  ;;  %p58_p2 = scmp.eq.s32.totalorder %s1948_s14, 0 }
  0x18   : > { %s3287_s17 = smov (%p41_p0, %s40_s17), 0  ;;  %s3289_s18 = smov (!%p41_p0, %s43_s18), %s1944_s13 }
  0x19   : > { %3256 = sst [smem:[#allocation24_spill]] %s3287_s17  ;;  %s47_s20 = ssub.s32 %s1940_s12, %s3287_s17 }
  0x1a   : > { %p2084_p3 = por %p58_p2, %p57_p1  ;;  %p45_p4 = scmp.ge.s32.totalorder %s3289_s18, 2 }
  0x1b   : > { %p48_p5 = scmp.eq.s32.totalorder %s47_s20, 0  ;;  %p63_p6 = scmp.ne.s32.totalorder %s1924_s9, %s1920_s8 }
  0x1c   : > { %p64_p7 = scmp.eq.s32.totalorder %s1502_s15, 0  ;;  %s3291_s18 = smov (%p45_p4, %s3289_s18), 0 }
  0x1d   : > { %3258 = sst [smem:[#allocation25_spill]] %s3291_s18  ;;  %s164_s24 = ssub.s32 %s1944_s13, %s3291_s18 }
  0x1e   : > { %s2092_s22 = scalar_select %p48_p5, %s1928_s0, %s50_s19  }
  0x1f   : > { %p2094_p8 = por %p64_p7, %p63_p6  ;;  %s166_s25 = sor.u32 %s164_s24, %s47_s20 }
  0x20   : > { %3259 = sst [smem:[#allocation26_spill]] %s2092_s22  ;;  %s169_s26 = sadd.s32 1, %s1916_s30 }
  0x21   : > { %p167_p9 = scmp.eq.s32.totalorder %s166_s25, 0  ;;  %p179_p10 = scmp.ne.s32.totalorder %s1916_s30, %s1912_s29 }
  0x22   : > { %p180_p11 = scmp.eq.s32.totalorder %s1502_s15, 3  ;;  %p185_p12 = scmp.ne.s32.totalorder %s1912_s29, %s1908_s28 }
  0x23   : > { %s2106_s27 = scalar_select %p167_p9, %s1916_s30, %s169_s26  }
  0x24   : > { %p2108_p13 = por %p180_p11, %p179_p10  ;;  %p186_p0 = scmp.eq.s32.totalorder %s1503_s16, 3 }
  0x25   : > { %3261 = sst [smem:[#allocation27_spill]] %s2106_s27  ;;  %p1558_p1 = scmp.lt.s32.totalorder %s1948_s14, 4 }
  0x26   : > { %s3262_s8 = scalar_select %p2108_p13, 1, 0 }
  0x27   : > { %p2113_p2 = por %p186_p0, %p185_p12  ;;  %s215_s20 = sand.u32 1, %s1928_s0  }
  0x28   : > { %3263 = sst [smem:[#allocation28_spill]] %s3262_s8  ;;  %s1506_s24 = sshll.u32 %s215_s20, 8 }
  0x29   : > { %s3264_s19 = scalar_select %p2113_p2, 1, 0 }
  0x2a   : > { %s1541_s25 = sshll.u32 %s1940_s12, 8  ;;  %s3266_s2 = sld [smem:[#allocation30_spill]] }
  0x2b   : > { %3265 = sst [smem:[#allocation29_spill]] %s3264_s19  ;;  %s219_s26 = scalar_lea.vmem [#allocation6], %s1506_s24 }
  0x2c   : > { %s228_s13 = sshll.u32 %s219_s26, 4  ;;  %p1551_p4 = pnand %p1558_p1, %p2084_p3  ;;  %s229_s13 = int_to_ptr.vmem [resolvable:$true] %s228_s13 }
  0x2d   : > { %p1510_p5 = scmp.ge.s32.totalorder %s1948_s14, 1  ;;  %s216_s16 = scalar_lea.sflag [#allocation7], %s215_s20 }
  0x2e   : > { %s1963_s27 = smov 256   ;;  %s1964_s30 = smov 16  }
  0x2f   : > { %p248_p6 = scmp.lt.s32.totalorder %s1948_s14, 5 }
  0x30   : > { %s225_s17 = scalar_lea.hbm %s3266_s2, %s1541_s25 }
  0x31   : > { %s226_s22 = sshll.u32 %s225_s17, 4  ;;  %p249_p7 = pnand %p1510_p5, %p248_p6  ;;  %s227_s22 = int_to_ptr.hbm [resolvable:$true] %s226_s22 }
  0x32   : > { %1553 = dma.hbm_to_vmem [thread:$0]  (!%p1551_p4), %s227_s22, 4096, %s229_s13, %s216_s16, %s1963_s27, %s1963_s27, %s1964_s30  }
  0x33   : > { %252 = sbr.rel (%p249_p7) target bundleno = 664 (0x298), region = 40  ;;  %s254_s12 = sand.u32 (!%p249_p7), 1, %s1924_s9  }
  0x34   : > { %s1511_s18 = sshll.u32 (!%p249_p7), %s254_s12, 8  ;;  %s255_s25 = scalar_lea.sflag (!%p249_p7), [#allocation7], %s254_s12 }
  0x35   : > { %s2127_s24 = scalar_lea.vmem (!%p249_p7), [#allocation6], %s1511_s18 }
  0x38   : > { %1897 = dma.done.wait (%p2094_p8), %s255_s25, 4096  }
  0x39   : > { %1899 = vsyncadd (%p2094_p8), %s255_s25, 4294963200  ;;  %s3236_s30 = sand.u32 1, %s1912_s29   ;;  %p296_p3 = scmp.lt.s32.totalorder %s1936_s11, 1 }
  0x3a   : > { %s1512_s12 = sshll.u32 %s3236_s30, 8  ;;  %p298_p9 = scmp.lt.s32.totalorder %s1932_s10, 1 }
  0x3b   : > { %p306_p10 = scmp.lt.s32.totalorder %s1932_s10, 0  ;;  %s307_s22 = ssub.s32 0, %s1932_s10 }
  0x3c   : > { %s297_s13 = scalar_select %p296_p3, %s1936_s11, 1 }
  0x3d   : > { %s299_s17 = scalar_select %p298_p9, %s1932_s10, 1 }
  0x3e   : > { %s1514_s21 = sshll.u32 %s297_s13, 5  ;;  %s1516_s27 = smin.u32 %s1932_s10, %s307_s22 }
  0x3f   : > { %s1513_s23 = sshll.u32 %s299_s17, 4  ;;  %s309_s15 = sand.u32 1, %s1516_s27  }
  0x40   : > { %s302_s20 = sadd.s32 %s1514_s21, %s1513_s23  ;;  %s310_s16 = ssub.s32 0, %s309_s15 }
  0x41   : > { %s1515_s26 = sshll.u32 %s302_s20, 3  ;;  %s3267_s3 = sld [smem:[#allocation31_spill]] }
  0x42   : > { %s3293_s16 = smov (!%p306_p10, %s310_s16), %s309_s15  ;;  %s2150_s0 = scalar_lea.vmem [#allocation9], %s1512_s12 }
  0x43   : > { %p1518_p8 = scmp.lt.s32.totalorder %s3293_s16, 0  ;;  %s316_s30 = sadd.s32 2, %s3293_s16 }
  0x44   : > { %p1519_p11 = scmp.ne.s32.totalorder %s1932_s10, 0 }
  0x45   : > { %s3295_s30 = smov (!%p1518_p8, %s316_s30), %s3293_s16  ;;  %s1520_s13 = sshll.u32 (!%p1519_p11), %s1936_s11, 8 }
  0x46   : > { %321 = sbr.rel (%p1519_p11) target bundleno = 116 (0x74), region = 48  ;;  %s2154_s17 = smov (!%p1519_p11), 0  }
  0x47   : > { %s2146_s2 = scalar_lea.vmem %s3267_s3, %s1515_s26 }
  0x4b LB: >> { %s329_s21 = sadd.s32 %s1952_s17, %s1520_s13  ;;  %s336_s12 = sshrl.u32 %s1952_s17, 3  ;;  %s1952_s17 = sphi %s2154_s17, %s328_s17  }
  0x4c   : >> { %s330_s22 = sld [smem:[#allocation5 + %s329_s21]]  ;;  %s337_s23 = sand.u32 7, %s1952_s17  }
  0x4d   : >> { %s1522_s27 = sshll.u32 %s336_s12, 4 }
  0x4e   : >> { %s339_s20 = sadd.s32 %s1522_s27, %s337_s23 }
  0x4f   : >> { %s340_s15 = scalar_lea.vmem [#allocation2], %s339_s20  ;;  %s1766_s20 = scalar_lea.hbm %s3224_s1, 2000 }
  0x50   : >> { %s2164_s26 = sshll.u32 %s340_s15, 4  ;;  %s344_s26 = int_to_ptr.vmem [resolvable:$true] %s2164_s26 }
  0x52   : >> { %s331_s16 = sshrl.u32 %s330_s22, 3  ;;  %s332_s18 = sand.u32 7, %s330_s22  }
  0x53   : >> { %s1521_s25 = sshll.u32 %s331_s16, 4 }
  0x54   : >> { %s334_s3 = sadd.s32 %s1521_s25, %s332_s18 }
  0x55   : >> { %s335_s28 = scalar_lea.hbm %s3224_s1, %s334_s3 }
  0x56   : >> { %s2170_s14 = sshll.u32 %s335_s28, 4  ;;  %s342_s14 = int_to_ptr.hbm [resolvable:$true] %s2170_s14 }
  0x57   : >> { %s1762_s21 = sshra.s32 %s342_s14, 4  ;;  %s1763_s21 = int_to_ptr.hbm [resolvable:$true] %s1762_s21 }
  0x58   : >> { %s1764_s12 = scalar_lea.hbm %s1763_s21, 2  ;;  %p1767_p0 = scmp.lt.s32.totalorder %s1763_s21, %s3224_s1 }
  0x59   : >> { %p1765_p12 = scmp.ne.s32.totalorder %s1763_s21, %s1764_s12  ;;  %p1768_p1 = scmp.lt.s32.totalorder %s1766_s20, %s1764_s12 }
  0x5b   : >> { %p1769_p4 = por %p1768_p1, %p1767_p0 }
  0x5d   : >> { %p1770_p5 = pnand %p1769_p4, %p1765_p12 }
  0x5f   : >> { %1773 = shalt.err (!%p1770_p5)  }
  0x60   : >> { %s1774_s3 = sshra.s32 %s344_s26, 4  ;;  %s1965_s9 = smov [#allocation2]   ;;  %s1775_s3 = int_to_ptr.vmem [resolvable:$true] %s1774_s3 }
  0x61   : >> { %s1776_s28 = scalar_lea.vmem %s1775_s3, 2  ;;  %s1778_s19 = scalar_lea.vmem %s1965_s9, 512 }
  0x62   : >> { %p1777_p6 = scmp.ne.s32.totalorder %s1775_s3, %s1776_s28  ;;  %p1779_p7 = scmp.lt.s32.totalorder %s1775_s3, [#allocation2] }
  0x63   : >> { %p1780_p3 = scmp.lt.s32.totalorder %s1778_s19, %s1776_s28 }
  0x65   : >> { %p1781_p9 = por %p1780_p3, %p1779_p7 }
  0x67   : >> { %p1782_p10 = pnand %p1781_p9, %p1777_p6 }
  0x69   : >> { %1785 = shalt.err (!%p1782_p10)  }
  0x6a   : >> { %s1966_s16 = smov 128   ;;  %s1967_s18 = smov 1  }
  0x6b   : >> { %348 = dma.hbm_to_vmem [thread:$0]  %s342_s14, 32, %s344_s26, [#allocation3], %s1966_s16, %s1966_s16, %s1967_s18 }
  0x6c   : >> { %s328_s17 = sadd.s32 1, %s1952_s17  }
  0x6d   : >> { %p325_p8 = scmp.ge.s32.totalorder %s328_s17, 128  }
  0x6f   : > { %327 = sbr.rel (!%p325_p8) target bundleno = 75 (0x4b), region = 125 }
  0x74 PF: > { %s349_s25 = sadd.s32 1, %s1932_s10 }
  0x75   : > { %p1523_p11 = scmp.ge.s32.totalorder %s349_s25, 2 }
  0x76   : > { %s1524_s12 = sshll.u32 (!%p1523_p11), %s1936_s11, 8  ;;  %s1542_s23 = sshll.u32 (!%p1523_p11), %s1932_s10, 7 }
  0x77   : > { %353 = sbr.rel (%p1523_p11) target bundleno = 166 (0xa6), region = 59  ;;  %s1543_s27 = sadd.s32 (!%p1523_p11), 128, %s1542_s23 }
  0x78   : > { %s2190_s20 = sadd.s32 (!%p1523_p11), %s1543_s27, %s1524_s12  ;;  %s2192_s14 = smov (!%p1523_p11), 0  }
  0x7c LB: >> { %s3268_s21 = ssub.s32 1, %s3295_s30  ;;  %s364_s17 = sadd.s32 %s1956_s14, %s2190_s20  ;;  %s1956_s14 = sphi %s2192_s14, %s363_s14  }
  0x7d   : >> { %s1528_s13 = sshll.u32 %s3268_s21, 8  ;;  %s371_s26 = sshrl.u32 %s1956_s14, 3 }
  0x7e   : >> { %s365_s22 = sld [smem:[#allocation5 + %s364_s17]]  ;;  %s372_s15 = sand.u32 7, %s1956_s14  }
  0x7f   : >> { %s1527_s3 = sshll.u32 %s371_s26, 4  ;;  %s3269_s17 = ssub.s32 1, %s3295_s30 }
  0x80   : >> { %s374_s28 = sadd.s32 %s1527_s3, %s372_s15  ;;  %s378_s26 = scalar_lea.sflag [#allocation3], %s3269_s17 }
  0x81   : >> { %s376_s9 = sadd.s32 %s1528_s13, %s374_s28  ;;  %s1790_s28 = scalar_lea.hbm %s3224_s1, 2000 }
  0x82   : >> { %s377_s19 = scalar_lea.vmem [#allocation2], %s376_s9 }
  0x83   : >> { %s381_s16 = sshll.u32 %s377_s19, 4  ;;  %s2206_s16 = int_to_ptr.vmem [resolvable:$true] %s381_s16 }
  0x84   : >> { %s366_s18 = sshrl.u32 %s365_s22, 3  ;;  %s367_s25 = sand.u32 7, %s365_s22  }
  0x85   : >> { %s1526_s12 = sshll.u32 %s366_s18, 4 }
  0x86   : >> { %s369_s23 = sadd.s32 %s1526_s12, %s367_s25 }
  0x87   : >> { %s370_s29 = scalar_lea.hbm %s3224_s1, %s369_s23 }
  0x88   : >> { %s2208_s21 = sshll.u32 %s370_s29, 4  ;;  %s380_s21 = int_to_ptr.hbm [resolvable:$true] %s2208_s21 }
  0x89   : >> { %s1786_s13 = sshra.s32 %s380_s21, 4  ;;  %s1787_s13 = int_to_ptr.hbm [resolvable:$true] %s1786_s13 }
  0x8a   : >> { %s1788_s15 = scalar_lea.hbm %s1787_s13, 2  ;;  %p1791_p0 = scmp.lt.s32.totalorder %s1787_s13, %s3224_s1 }
  0x8b   : >> { %p1789_p12 = scmp.ne.s32.totalorder %s1787_s13, %s1788_s15  ;;  %p1792_p1 = scmp.lt.s32.totalorder %s1790_s28, %s1788_s15 }
  0x8d   : >> { %p1793_p4 = por %p1792_p1, %p1791_p0 }
  0x8f   : >> { %p1794_p5 = pnand %p1793_p4, %p1789_p12 }
  0x91   : >> { %1797 = shalt.err (!%p1794_p5)  }
  0x92   : >> { %s1798_s29 = sshra.s32 %s2206_s16, 4  ;;  %s1968_s18 = smov [#allocation2]   ;;  %s1799_s29 = int_to_ptr.vmem [resolvable:$true] %s1798_s29 }
  0x93   : >> { %s1800_s19 = scalar_lea.vmem %s1799_s29, 2  ;;  %s1802_s25 = scalar_lea.vmem %s1968_s18, 512 }
  0x94   : >> { %p1801_p6 = scmp.ne.s32.totalorder %s1799_s29, %s1800_s19  ;;  %p1803_p7 = scmp.lt.s32.totalorder %s1799_s29, [#allocation2] }
  0x95   : >> { %p1804_p3 = scmp.lt.s32.totalorder %s1802_s25, %s1800_s19 }
  0x97   : >> { %p1805_p9 = por %p1804_p3, %p1803_p7 }
  0x99   : >> { %p1806_p10 = pnand %p1805_p9, %p1801_p6 }
  0x9b   : >> { %1809 = shalt.err (!%p1806_p10)  }
  0x9c   : >> { %s1969_s12 = smov 128   ;;  %s1970_s23 = smov 1  }
  0x9d   : >> { %386 = dma.hbm_to_vmem [thread:$0]  %s380_s21, 32, %s2206_s16, %s378_s26, %s1969_s12, %s1969_s12, %s1970_s23 }
  0x9e   : >> { %s363_s14 = sadd.s32 1, %s1956_s14  }
  0x9f   : >> { %p360_p8 = scmp.ge.s32.totalorder %s363_s14, 128  }
  0xa1   : > { %362 = sbr.rel (!%p360_p8) target bundleno = 124 (0x7c), region = 136 }
  0xa6 PF: > { %s1958_s27 = smov 0  }
  0xa7 LB: >> { %s393_s17 = scalar_lea.sflag [#allocation3], %s3295_s30  ;;  %s1960_s27 = sphi %s1958_s27, %s392_s27  }
  0xa8   : >> { %1900 = dma.done.wait %s393_s17, 32 }
  0xa9   : >> { %1901 = vsyncadd %s393_s17, 4294967264  ;;  %s392_s27 = sadd.s32 1, %s1960_s27  }
  0xaa   : >> { %p389_p11 = scmp.ge.s32.totalorder %s392_s27, 128  }
  0xab   : > { %v2230_v0 = vld [vmem:[%s2146_s2 + $0x20] sm:$0xff] (%p389_p11)  ;;  %v2233_v1 = vld [vmem:[%s2146_s2 + $0x10] sm:$0xff] (%p389_p11)  ;;  %v1971_v3 = vmov (%p389_p11), 0   ;;  %v2248_v7 = vld [vmem:[%s2146_s2 + $0x28] sm:$0xff] (%p389_p11)  ;;  %s1545_s13 = sshll.u32 (%p389_p11), %s1932_s10, 5  ;;  %s1534_s15 = sshll.u32 (%p389_p11), %s1936_s11, 6 }
  0xac   : > { %391 = sbr.rel (!%p389_p11) target bundleno = 167 (0xa7), region = 147  ;;  %v2236_v2 = vld [vmem:[%s2146_s2] sm:$0xff] (%p389_p11)  ;;  %1685 = vset.pattern.permute.xlu2 (%p389_p11), %v1971_v3  ;;  %1684 = vset.pattern.permute.xlu1 (%p389_p11), %v1971_v3  ;;  %vm485_vm0 = vcmp.eq.s32.totalorder (%p389_p11), %v2230_v0, 0  ;;  %vm483_vm1 = vcmp.eq.s32.totalorder (%p389_p11), %v2233_v1, 0  ;;  %v2251_v8 = vld [vmem:[%s2146_s2 + $0x18] sm:$0xff] (%p389_p11)  ;;  %v465_v9 = vld [vmem:[%s2146_s2 + $0x8] sm:$0xff] (%p389_p11)  ;;  %s3118_s10 = sadd.s32 (%p389_p11), %s1545_s13, %s1534_s15 }
  0xad   : > { %vm481_vm2 = vcmp.eq.s32.totalorder (%p389_p11), %v2236_v2, 0  ;;  %1683 = vset.pattern.permute.xlu0 (%p389_p11), %v1971_v3  ;;  %v501_v4 = vsel (%p389_p11), %vm485_vm0, 1, %v1971_v3  ;;  %v499_v5 = vsel (%p389_p11), %vm483_vm1, 1, %v1971_v3  ;;  %vm486_vm3 = vcmp.eq.s32.totalorder (%p389_p11), %v2248_v7, 0  ;;  %v2260_v13 = vld [vmem:[%s2146_s2 + $0x40] sm:$0xff] (%p389_p11)  ;;  %v471_v14 = vld [vmem:[%s2146_s2 + $0x38] sm:$0xff] (%p389_p11) }
  0xae   : > { %v497_v6 = vsel (%p389_p11), %vm481_vm2, 1, %v1971_v3  ;;  %526 = vperm.xlu2 (%p389_p11), %1685, %v501_v4   ;;  %520 = vperm.xlu1 (%p389_p11), %1684, %v499_v5   ;;  %vm484_vm4 = vcmp.eq.s32.totalorder (%p389_p11), %v2251_v8, 0  ;;  %vm482_vm5 = vcmp.eq.s32.totalorder (%p389_p11), %v465_v9, 0  ;;  %v502_v10 = vsel (%p389_p11), %vm486_vm3, 1, %v1971_v3  ;;  %v470_v15 = vld [vmem:[%s2146_s2 + $0x30] sm:$0xff] (%p389_p11)  ;;  %v2269_v19 = vld [vmem:[%s2146_s2 + $0x58] sm:$0xff] (%p389_p11) }
  0xaf   : > { %514 = vperm.xlu0 (%p389_p11), %1683, %v497_v6   ;;  %v500_v11 = vsel (%p389_p11), %vm484_vm4, 1, %v1971_v3  ;;  %v498_v12 = vsel (%p389_p11), %vm482_vm5, 1, %v1971_v3  ;;  %vm489_vm6 = vcmp.eq.s32.totalorder (%p389_p11), %v2260_v13, 0  ;;  %vm488_vm7 = vcmp.eq.s32.totalorder (%p389_p11), %v471_v14, 0  ;;  %v474_v20 = vld [vmem:[%s2146_s2 + $0x50] sm:$0xff] (%p389_p11)  ;;  %v473_v21 = vld [vmem:[%s2146_s2 + $0x48] sm:$0xff] (%p389_p11) }
  0xb0   : > { %vm487_vm8 = vcmp.eq.s32.totalorder (%p389_p11), %v470_v15, 0  ;;  %v505_v16 = vsel (%p389_p11), %vm489_vm6, 1, %v1971_v3  ;;  %v504_v17 = vsel (%p389_p11), %vm488_vm7, 1, %v1971_v3  ;;  %vm492_vm9 = vcmp.eq.s32.totalorder (%p389_p11), %v2269_v19, 0  ;;  %v2278_v25 = vld [vmem:[%s2146_s2 + $0x70] sm:$0xff] (%p389_p11)  ;;  %v477_v26 = vld [vmem:[%s2146_s2 + $0x68] sm:$0xff] (%p389_p11) }
  0xb1   : > { %v503_v18 = vsel %vm487_vm8, 1, %v1971_v3  ;;  %vm491_vm10 = vcmp.eq.s32.totalorder %v474_v20, 0  ;;  %vm490_vm11 = vcmp.eq.s32.totalorder %v473_v21, 0  ;;  %v508_v22 = vsel %vm492_vm9, 1, %v1971_v3  ;;  %v476_v27 = vld [vmem:[%s2146_s2 + $0x60] sm:$0xff]  ;;  %v479_v31 = vld [vmem:[%s2146_s2 + $0x78] sm:$0xff] }
  0xb2   : > { %v507_v23 = vsel %vm491_vm10, 1, %v1971_v3  ;;  %v506_v24 = vsel %vm490_vm11, 1, %v1971_v3  ;;  %vm495_vm12 = vcmp.eq.s32.totalorder %v2278_v25, 0  ;;  %vm494_vm13 = vcmp.eq.s32.totalorder %v477_v26, 0  ;;  %s1544_s2 = sshll.u32 %s3295_s30, 8  ;;  %s1535_s11 = sshll.u32 %s3118_s10, 3 }
  0xb3   : > { %vm493_vm14 = vcmp.eq.s32.totalorder %v476_v27, 0  ;;  %v511_v28 = vsel %vm495_vm12, 1, %v1971_v3  ;;  %v510_v29 = vsel %vm494_vm13, 1, %v1971_v3  ;;  %vm617_vm15 = vcmp.eq.s32.totalorder %v465_v9, 1  ;;  %v480_v55 = vld [vmem:[%s3227_s4] sm:$0xf]  ;;  %s1344_s28 = scalar_lea.hbm %s3230_s7, %s1535_s11 }
  0xb4   : > { %v509_v30 = vsel %vm493_vm14, 1, %v1971_v3  ;;  %vm616_vm0 = vcmp.eq.s32.totalorder %v2236_v2, 1  ;;  %vm496_vm1 = vcmp.eq.s32.totalorder %v479_v31, 0  ;;  %v633_v32 = vsel %vm617_vm15, 1, %v1971_v3  ;;  %s2330_s14 = scalar_lea.vmem [#allocation2], %s1544_s2  ;;  %v435_v2 = vld [vmem:[%s2127_s24 + $0x18] sm:$0xff] }
  0xb5   : > { %v632_v33 = vsel %vm616_vm0, 1, %v1971_v3  ;;  %v512_v34 = vsel %vm496_vm1, 1, %v1971_v3  ;;  %vm620_vm2 = vcmp.eq.s32.totalorder %v2230_v0, 1  ;;  %vm619_vm3 = vcmp.eq.s32.totalorder %v2251_v8, 1  ;;  %v402_v63 = vld [vmem:[%s2330_s14 + $0x10] sm:$0xff]  ;;  %v403_v0 = vld [vmem:[%s2330_s14 + $0x18] sm:$0xff] }
  0xb6   : > { %529 = vperm.xlu2 %1685, %v502_v10   ;;  %523 = vperm.xlu1 %1684, %v500_v11   ;;  %vm618_vm4 = vcmp.eq.s32.totalorder %v2233_v1, 1  ;;  %v636_v35 = vsel %vm620_vm2, 1, %v1971_v3  ;;  %v635_v36 = vsel %vm619_vm3, 1, %v1971_v3  ;;  %vm623_vm5 = vcmp.eq.s32.totalorder %v471_v14, 1  ;;  %v434_v1 = vld [vmem:[%s2127_s24 + $0x10] sm:$0xff]  ;;  %s3270_s8 = sld [smem:[#allocation17_spill]] }
  0xb7   : > { %517 = vperm.xlu0 %1683, %v498_v12   ;;  %v634_v37 = vsel %vm618_vm4, 1, %v1971_v3  ;;  %vm622_vm6 = vcmp.eq.s32.totalorder %v470_v15, 1  ;;  %vm621_vm7 = vcmp.eq.s32.totalorder %v2248_v7, 1  ;;  %v639_v38 = vsel %vm623_vm5, 1, %v1971_v3  ;;  %s1345_s9 = sshll.u32 %s2150_s0, 4  ;;  %s1347_s29 = sshll.u32 %s1344_s28, 4  ;;  %s1346_s9 = int_to_ptr.vmem [resolvable:$true] %s1345_s9  ;;  %s1348_s29 = int_to_ptr.hbm [resolvable:$true] %s1347_s29 }
  0xb8   : > { %v638_v39 = vsel %vm622_vm6, 1, %v1971_v3  ;;  %v637_v40 = vsel %vm621_vm7, 1, %v1971_v3  ;;  %vm626_vm8 = vcmp.eq.s32.totalorder %v474_v20, 1  ;;  %vm625_vm9 = vcmp.eq.s32.totalorder %v473_v21, 1  ;;  %s1824_s12 = sshra.s32 %s1348_s29, 4  ;;  %s1830_s2 = scalar_lea.hbm %s3230_s7, 1024  ;;  %s1825_s12 = int_to_ptr.hbm [resolvable:$true] %s1824_s12 }
  0xb9   : > { %vm624_vm10 = vcmp.eq.s32.totalorder %v2260_v13, 1  ;;  %v642_v41 = vsel %vm626_vm8, 1, %v1971_v3  ;;  %v641_v42 = vsel %vm625_vm9, 1, %v1971_v3  ;;  %vm629_vm11 = vcmp.eq.s32.totalorder %v477_v26, 1  ;;  %v433_v26 = vld [vmem:[%s2127_s24 + $0x8] sm:$0xff]  ;;  %s1826_s23 = scalar_lea.hbm %s1825_s12, 256  ;;  %p1831_p4 = scmp.lt.s32.totalorder %s1825_s12, %s3230_s7 }
  0xba   : > { %v640_v43 = vsel %vm624_vm10, 1, %v1971_v3  ;;  %vm628_vm12 = vcmp.eq.s32.totalorder %v476_v27, 1  ;;  %vm627_vm13 = vcmp.eq.s32.totalorder %v2269_v19, 1  ;;  %v645_v44 = vsel %vm629_vm11, 1, %v1971_v3  ;;  %p1827_p12 = scmp.ne.s32.totalorder %s1825_s12, %s1826_s23  ;;  %p1832_p5 = scmp.lt.s32.totalorder %s1830_s2, %s1826_s23 }
  0xbb   : > { %v644_v45 = vsel %vm628_vm12, 1, %v1971_v3  ;;  %v643_v46 = vsel %vm627_vm13, 1, %v1971_v3  ;;  %vm631_vm14 = vcmp.eq.s32.totalorder %v479_v31, 1  ;;  %vm630_vm15 = vcmp.eq.s32.totalorder %v2278_v25, 1  ;;  %v432_v25 = vld [vmem:[%s2127_s24] sm:$0xff] }
  0xbc   : > { %v647_v47 = vsel %vm631_vm14, 1, %v1971_v3  ;;  %v646_v48 = vsel %vm630_vm15, 1, %v1971_v3  ;;  %v712_v59 = vperm.slane %v480_v55, 1  ;;  %v713_v60 = vperm.slane %v480_v55, 3  ;;  %s3272_s18 = sand.u32 1, %s3270_s8   ;;  %p1828_p0 = pnand %p1827_p12, %p2108_p13 }
  0xbd   : > { %v578_v61 = vperm.slane %v480_v55, 0  ;;  %v579_v62 = vperm.slane %v480_v55, 2  ;;  %v752_v7 = vadd.f32 %v434_v1, %v402_v63  ;;  %v753_v8 = vadd.f32 %v435_v2, %v403_v0  ;;  %v409_v1 = vld [vmem:[%s2330_s14 + $0x48] sm:$0xff]  ;;  %v440_v2 = vld [vmem:[%s2127_s24 + $0x40] sm:$0xff]  ;;  %s1330_s25 = scalar_lea.sflag [#allocation8], %s3272_s18  ;;  %p1833_p6 = por %p1832_p5, %p1831_p4 }
  0xbe   : > { %538 = vperm.xlu2 %1685, %v505_v16   ;;  %535 = vperm.xlu1 %1684, %v504_v17   ;;  %v2336_v3 = vperm.slane %v712_v59, 1  ;;  %v2338_v4 = vperm.slane %v713_v60, 1  ;;  %v408_v60 = vld [vmem:[%s2330_s14 + $0x40] sm:$0xff]  ;;  %p1829_p1 = pneg %p1828_p0 }
  0xbf   : > { %532 = vperm.xlu0 %1683, %v503_v18   ;;  %v2340_v5 = vperm.slane %v578_v61, 0  ;;  %v2342_v6 = vperm.slane %v579_v62, 0 }
  0xc0   : > { %p1834_p7 = pnand %p1833_p6, %p1829_p1 }
  0xc6   : > { %547 = vperm.xlu2 %1685, %v508_v22   ;;  %544 = vperm.xlu1 %1684, %v507_v23   ;;  %v400_v23 = vld [vmem:[%s2330_s14] sm:$0xff] }
  0xc7   : > { %541 = vperm.xlu0 %1683, %v506_v24   ;;  %v401_v24 = vld [vmem:[%s2330_s14 + $0x8] sm:$0xff]  ;;  %v750_v27 = vadd.f32 %v432_v25, %v400_v23 }
  0xc8   : > { %v413_v23 = vld [vmem:[%s2330_s14 + $0x68] sm:$0xff] }
  0xce   : > { %556 = vperm.xlu2 %1685, %v511_v28   ;;  %553 = vperm.xlu1 %1684, %v510_v29   ;;  %v751_v28 = vadd.f32 %v433_v26, %v401_v24  ;;  %v446_v24 = vld [vmem:[%s2127_s24 + $0x70] sm:$0xff] }
  0xcf   : > { %550 = vperm.xlu0 %1683, %v509_v30  }
  0xd6   : > { %652 = vperm.xlu2 %1685, %v633_v32   ;;  %649 = vperm.xlu1 %1684, %v632_v33  }
  0xd7   : > { %559 = vperm.xlu0 %1683, %v512_v34  }
  0xde   : > { %661 = vperm.xlu2 %1685, %v636_v35   ;;  %658 = vperm.xlu1 %1684, %v635_v36  }
  0xdf   : > { %655 = vperm.xlu0 %1683, %v634_v37  }
  0xe6   : > { %670 = vperm.xlu2 %1685, %v639_v38   ;;  %667 = vperm.xlu1 %1684, %v638_v39   ;;  %v406_v38 = vld [vmem:[%s2330_s14 + $0x30] sm:$0xff]  ;;  %v407_v39 = vld [vmem:[%s2330_s14 + $0x38] sm:$0xff] }
  0xe7   : > { %664 = vperm.xlu0 %1683, %v637_v40   ;;  %v438_v40 = vld [vmem:[%s2127_s24 + $0x30] sm:$0xff] }
  0xee   : > { %679 = vperm.xlu2 %1685, %v642_v41   ;;  %676 = vperm.xlu1 %1684, %v641_v42   ;;  %v439_v41 = vld [vmem:[%s2127_s24 + $0x38] sm:$0xff] }
  0xef   : > { %673 = vperm.xlu0 %1683, %v640_v43   ;;  %v404_v43 = vld [vmem:[%s2330_s14 + $0x20] sm:$0xff] }
  0xf6   : > { %688 = vperm.xlu2 %1685, %v645_v44   ;;  %685 = vperm.xlu1 %1684, %v644_v45   ;;  %v405_v45 = vld [vmem:[%s2330_s14 + $0x28] sm:$0xff] }
  0xf7   : > { %682 = vperm.xlu0 %1683, %v643_v46   ;;  %v436_v46 = vld [vmem:[%s2127_s24 + $0x20] sm:$0xff] }
  0xf8   : > { %v754_v63 = vadd.f32 %v436_v46, %v404_v43 }
  0xfe   : > { %694 = vperm.xlu1 %1684, %v647_v47   ;;  %v437_v47 = vld [vmem:[%s2127_s24 + $0x28] sm:$0xff] }
  0xff   : > { %691 = vperm.xlu0 %1683, %v646_v48   ;;  %v755_v0 = vadd.f32 %v437_v47, %v405_v45 }
 0x108   : > { %v2312_v49 = vpop.permute.xlu2 %526 }
 0x109   : > { %vm565_vm4 = vcmp.eq.s32.totalorder %v2312_v49, 1  ;;  %v756_v49 = vadd.f32 %v438_v40, %v406_v38  ;;  %v442_v40 = vld [vmem:[%s2127_s24 + $0x50] sm:$0xff] }
 0x10a   : > { %v592_v44 = vsel %vm565_vm4, %v2340_v5, 0.0  ;;  %v593_v48 = vsel %vm565_vm4, %v2342_v6, 0.0 }
 0x110   : > { %v2314_v50 = vpop.permute.xlu2 %529 }
 0x111   : > { %vm566_vm5 = vcmp.eq.s32.totalorder %v2314_v50, 1  ;;  %v757_v50 = vadd.f32 %v439_v41, %v407_v39  ;;  %v411_v39 = vld [vmem:[%s2330_s14 + $0x58] sm:$0xff] }
 0x112   : > { %v2402_v55 = vsel %vm566_vm5, %v2342_v6, 0.0  ;;  %v443_v41 = vld [vmem:[%s2127_s24 + $0x58] sm:$0xff] }
 0x118   : > { %v2316_v51 = vpop.permute.xlu2 %538 }
 0x119   : > { %vm569_vm8 = vcmp.eq.s32.totalorder %v2316_v51, 1 }
 0x120   : > { %v2318_v52 = vpop.permute.xlu2 %547  ;;  %v2320_v53 = vpop.permute.xlu1 %520 }
 0x121   : > { %v515_v54 = vpop.permute.xlu0 %514  ;;  %vm563_vm7 = vcmp.eq.s32.totalorder %v2320_v53, 1  ;;  %v412_v53 = vld [vmem:[%s2330_s14 + $0x60] sm:$0xff]  ;;  %vm572_vm13 = vcmp.eq.s32.totalorder %v2318_v52, 1 }
 0x122   : > { %vm561_vm2 = vcmp.eq.s32.totalorder %v515_v54, 1  ;;  %v2399_v54 = vsel %vm566_vm5, %v2340_v5, 0.0 }
 0x123   : > { %v584_v30 = vsel %vm561_vm2, %v2340_v5, 0.0  ;;  %v585_v31 = vsel %vm561_vm2, %v2342_v6, 0.0 }
 0x128   : > { %v2326_v56 = vpop.permute.xlu2 %556  ;;  %v2328_v57 = vpop.permute.xlu1 %523 }
 0x129   : > { %v518_v58 = vpop.permute.xlu0 %517  ;;  %vm564_vm6 = vcmp.eq.s32.totalorder %v2328_v57, 1  ;;  %v589_v57 = vsel %vm563_vm7, %v2342_v6, 0.0 }
 0x12a   : > { %vm562_vm0 = vcmp.eq.s32.totalorder %v518_v58, 1  ;;  %v590_v58 = vsel %vm564_vm6, %v2340_v5, 0.0  ;;  %v591_v61 = vsel %vm564_vm6, %v2342_v6, 0.0 }
 0x12b   : > { %v586_v11 = vsel %vm562_vm0, %v2340_v5, 0.0  ;;  %v587_v12 = vsel %vm562_vm0, %v2342_v6, 0.0 }
 0x130   : > { %v2344_v9 = vpop.permute.xlu1 %535  ;;  %v653_v10 = vpop.permute.xlu2 %652 }
 0x131   : > { %vm697_vm1 = vcmp.eq.s32.totalorder %v653_v10, 1  ;;  %v2348_v13 = vpop.permute.xlu0 %532  ;;  %vm568_vm14 = vcmp.eq.s32.totalorder %v2344_v9, 1 }
 0x132   : > { %v720_v14 = vsel %vm697_vm1, %v2336_v3, %v586_v11  ;;  %v721_v15 = vsel %vm697_vm1, %v2338_v4, %v587_v12  ;;  %v414_v12 = vld [vmem:[%s2330_s14 + $0x70] sm:$0xff]  ;;  %vm567_vm12 = vcmp.eq.s32.totalorder %v2348_v13, 1 }
 0x133   : > { %v2352_v16 = vadd.f32 %v752_v7, %v720_v14  ;;  %v2354_v17 = vadd.f32 %v753_v8, %v721_v15  ;;  %v441_v7 = vld [vmem:[%s2127_s24 + $0x48] sm:$0xff]  ;;  %v588_v8 = vsel %vm563_vm7, %v2340_v5, 0.0 }
 0x135   : > { %v817_v18 = vadd.f32 %v2354_v17, %v2352_v16 }
 0x137   : > { %818 = vadd.xlane.f32.xlu0 %v817_v18 }
 0x138   : > { %v2358_v19 = vpop.permute.xlu1 %544  ;;  %v2372_v32 = vpop.permute.xlu2 %661 }
 0x139   : > { %v2360_v20 = vpop.permute.xlu0 %541  ;;  %vm700_vm10 = vcmp.eq.s32.totalorder %v2372_v32, 1  ;;  %v761_v32 = vadd.f32 %v443_v41, %v411_v39  ;;  %v448_v39 = vld [vmem:[%s2127_s24 + $0x80] sm:$0xff]  ;;  %v601_v41 = vsel %vm569_vm8, %v2342_v6, 0.0 }
 0x13a   : > { %v726_v43 = vsel %vm700_vm10, %v2336_v3, %v592_v44  ;;  %v727_v45 = vsel %vm700_vm10, %v2338_v4, %v593_v48  ;;  %v597_v48 = vsel %vm567_vm12, %v2342_v6, 0.0  ;;  %vm570_vm2 = vcmp.eq.s32.totalorder %v2360_v20, 1 }
 0x140   : > { %v2362_v21 = vpop.permute.xlu1 %553  ;;  %v2425_v14 = vpop.permute.xlu2 %670 }
 0x141   : > { %v2364_v22 = vpop.permute.xlu0 %550  ;;  %vm703_vm0 = vcmp.eq.s32.totalorder %v2425_v14, 1  ;;  %v602_v14 = vsel %vm570_vm2, %v2340_v5, 0.0 }
 0x142   : > { %vm573_vm7 = vcmp.eq.s32.totalorder %v2364_v22, 1 }
 0x143   : > { %v608_v52 = vsel %vm573_vm7, %v2340_v5, 0.0 }
 0x148   : > { %v650_v29 = vpop.permute.xlu1 %649 }
 0x149   : > { %vm696_vm3 = vcmp.eq.s32.totalorder %v650_v29, 1  ;;  %v2374_v33 = vpop.permute.xlu0 %559  ;;  %v410_v29 = vld [vmem:[%s2330_s14 + $0x50] sm:$0xff] }
 0x14a   : > { %v718_v34 = vsel %vm696_vm3, %v2336_v3, %v584_v30  ;;  %v719_v35 = vsel %vm696_vm3, %v2338_v4, %v585_v31  ;;  %v758_v30 = vadd.f32 %v440_v2, %v408_v60  ;;  %v759_v31 = vadd.f32 %v441_v7, %v409_v1  ;;  %v420_v2 = vld [vmem:[%s2330_s14 + $0xa0] sm:$0xff] }
 0x14b   : > { %v2379_v36 = vadd.f32 %v750_v27, %v718_v34  ;;  %v2381_v37 = vadd.f32 %v751_v28, %v719_v35  ;;  %v444_v27 = vld [vmem:[%s2127_s24 + $0x60] sm:$0xff]  ;;  %v445_v28 = vld [vmem:[%s2127_s24 + $0x68] sm:$0xff]  ;;  %vm571_vm3 = vcmp.eq.s32.totalorder %v2358_v19, 1 }
 0x14c   : > { %v762_v47 = vadd.f32 %v444_v27, %v412_v53  ;;  %v452_v53 = vld [vmem:[%s2127_s24 + $0xa0] sm:$0xff] }
 0x14d   : > { %v814_v42 = vadd.f32 %v2381_v37, %v2379_v36 }
 0x14f   : > { %815 = vadd.xlane.f32.xlu2 %v814_v42  ;;  %v2452_v42 = vsel %vm569_vm8, %v2340_v5, 0.0  ;;  %vm575_vm8 = vcmp.eq.s32.totalorder %v2326_v56, 1 }
 0x150   : > { %v659_v59 = vpop.permute.xlu1 %658 }
 0x151   : > { %vm699_vm9 = vcmp.eq.s32.totalorder %v659_v59, 1  ;;  %v656_v62 = vpop.permute.xlu0 %655  ;;  %v760_v59 = vadd.f32 %v442_v40, %v410_v29  ;;  %v680_v29 = vpop.permute.xlu2 %679  ;;  %v449_v40 = vld [vmem:[%s2127_s24 + $0x88] sm:$0xff] }
 0x152   : > { %v724_v10 = vsel %vm699_vm9, %v2336_v3, %v590_v58  ;;  %v725_v11 = vsel %vm699_vm9, %v2338_v4, %v591_v61  ;;  %vm698_vm11 = vcmp.eq.s32.totalorder %v656_v62, 1  ;;  %v596_v58 = vsel %vm567_vm12, %v2340_v5, 0.0 }
 0x153   : > { %v2427_v15 = vadd.f32 %v756_v49, %v724_v10  ;;  %v2429_v18 = vadd.f32 %v757_v50, %v725_v11  ;;  %v722_v25 = vsel %vm698_vm11, %v2336_v3, %v588_v8  ;;  %v723_v26 = vsel %vm698_vm11, %v2338_v4, %v589_v57  ;;  %v418_v11 = vld [vmem:[%s2330_s14 + $0x90] sm:$0xff] }
 0x154   : > { %v2440_v34 = vadd.f32 %v754_v63, %v722_v25  ;;  %v2442_v35 = vadd.f32 %v755_v0, %v723_v26  ;;  %v763_v49 = vadd.f32 %v445_v28, %v413_v23  ;;  %v764_v50 = vadd.f32 %v446_v24, %v414_v12  ;;  %v415_v63 = vld [vmem:[%s2330_s14 + $0x78] sm:$0xff]  ;;  %v450_v25 = vld [vmem:[%s2127_s24 + $0x90] sm:$0xff]  ;;  %v416_v26 = vld [vmem:[%s2330_s14 + $0x80] sm:$0xff] }
 0x155   : > { %v823_v38 = vadd.f32 %v2429_v18, %v2427_v15  ;;  %v2470_v61 = vadd.f32 %v758_v30, %v726_v43  ;;  %v2472_v62 = vadd.f32 %v759_v31, %v727_v45  ;;  %v447_v0 = vld [vmem:[%s2127_s24 + $0x78] sm:$0xff]  ;;  %v598_v23 = vsel %vm568_vm14, %v2340_v5, 0.0 }
 0x156   : > { %v820_v46 = vadd.f32 %v2442_v35, %v2440_v34  ;;  %v419_v12 = vld [vmem:[%s2330_s14 + $0x98] sm:$0xff]  ;;  %v765_v27 = vadd.f32 %v447_v0, %v415_v63  ;;  %v599_v28 = vsel %vm568_vm14, %v2342_v6, 0.0  ;;  %v732_v9 = vsel %vm703_vm0, %v2336_v3, %v598_v23  ;;  %v421_v0 = vld [vmem:[%s2330_s14 + $0xa8] sm:$0xff]  ;;  %v458_v23 = vld [vmem:[%s2127_s24 + $0xd0] sm:$0xff] }
 0x157   : > { %824 = vadd.xlane.f32.xlu2 %v823_v38  ;;  %v826_v31 = vadd.f32 %v2472_v62, %v2470_v61  ;;  %v417_v38 = vld [vmem:[%s2330_s14 + $0x88] sm:$0xff]  ;;  %v733_v43 = vsel %vm703_vm0, %v2338_v4, %v599_v28  ;;  %v768_v51 = vadd.f32 %v450_v25, %v418_v11  ;;  %vm706_vm5 = vcmp.eq.s32.totalorder %v680_v29, 1  ;;  %v422_v28 = vld [vmem:[%s2330_s14 + $0xb0] sm:$0xff] }
 0x158   : > { %v668_v44 = vpop.permute.xlu1 %667  ;;  %821 = vadd.xlane.f32.xlu1 %v820_v46  ;;  %v2526_v46 = vsel %vm572_vm13, %v2340_v5, 0.0  ;;  %v2537_v63 = vadd.f32 %v765_v27, %v733_v43  ;;  %v604_v25 = vsel %vm571_vm3, %v2340_v5, 0.0  ;;  %v457_v27 = vld [vmem:[%s2127_s24 + $0xc8] sm:$0xff]  ;;  %v607_v43 = vsel %vm572_vm13, %v2342_v6, 0.0 }
 0x159   : > { %vm702_vm15 = vcmp.eq.s32.totalorder %v668_v44, 1  ;;  %v665_v60 = vpop.permute.xlu0 %664  ;;  %v766_v44 = vadd.f32 %v448_v39, %v416_v26  ;;  %vm574_vm9 = vcmp.eq.s32.totalorder %v2362_v21, 1  ;;  %vm576_vm13 = vcmp.eq.s32.totalorder %v2374_v33, 1 }
 0x15a   : > { %v730_v1 = vsel %vm702_vm15, %v2336_v3, %v596_v58  ;;  %v731_v13 = vsel %vm702_vm15, %v2338_v4, %v597_v48  ;;  %vm701_vm1 = vcmp.eq.s32.totalorder %v665_v60, 1  ;;  %v2535_v60 = vadd.f32 %v764_v50, %v732_v9  ;;  %v455_v9 = vld [vmem:[%s2127_s24 + $0xb8] sm:$0xff] }
 0x15b   : > { %v728_v7 = vsel %vm701_vm1, %v2336_v3, %v2399_v54  ;;  %v729_v8 = vsel %vm701_vm1, %v2338_v4, %v2402_v55  ;;  %v2484_v57 = vadd.f32 %v762_v47, %v730_v1  ;;  %v2486_v10 = vadd.f32 %v763_v49, %v731_v13  ;;  %v451_v55 = vld [vmem:[%s2127_s24 + $0x98] sm:$0xff]  ;;  %v453_v1 = vld [vmem:[%s2127_s24 + $0xa8] sm:$0xff] }
 0x15c   : > { %v2494_v24 = vadd.f32 %v760_v59, %v728_v7  ;;  %v2496_v54 = vadd.f32 %v761_v32, %v729_v8  ;;  %v769_v47 = vadd.f32 %v451_v55, %v419_v12  ;;  %v770_v49 = vadd.f32 %v452_v53, %v420_v2  ;;  %v426_v2 = vld [vmem:[%s2330_s14 + $0xd0] sm:$0xff]  ;;  %v424_v12 = vld [vmem:[%s2330_s14 + $0xc0] sm:$0xff]  ;;  %v425_v53 = vld [vmem:[%s2330_s14 + $0xc8] sm:$0xff] }
 0x15d   : > { %v832_v30 = vadd.f32 %v2486_v10, %v2484_v57  ;;  %v767_v59 = vadd.f32 %v449_v40, %v417_v38  ;;  %v603_v32 = vsel %vm570_vm2, %v2342_v6, 0.0  ;;  %v835_v39 = vadd.f32 %v2537_v63, %v2535_v60  ;;  %v423_v40 = vld [vmem:[%s2330_s14 + $0xb8] sm:$0xff] }
 0x15e   : > { %v829_v45 = vadd.f32 %v2496_v54, %v2494_v24 }
 0x15f   : > { %827 = vadd.xlane.f32.xlu2 %v826_v31  ;;  %v605_v31 = vsel %vm571_vm3, %v2342_v6, 0.0 }
 0x160   : > { %830 = vadd.xlane.f32.xlu0 %v829_v45  ;;  %v677_v58 = vpop.permute.xlu1 %676  ;;  %833 = vadd.xlane.f32.xlu1 %v832_v30  ;;  %v771_v30 = vadd.f32 %v453_v1, %v421_v0  ;;  %v738_v45 = vsel %vm706_vm5, %v2336_v3, %v604_v25  ;;  %v739_v19 = vsel %vm706_vm5, %v2338_v4, %v605_v31  ;;  %v431_v25 = vld [vmem:[%s2330_s14 + $0xf8] sm:$0xff]  ;;  %v428_v31 = vld [vmem:[%s2330_s14 + $0xe0] sm:$0xff] }
 0x161   : > { %vm705_vm4 = vcmp.eq.s32.totalorder %v677_v58, 1  ;;  %v674_v48 = vpop.permute.xlu0 %673  ;;  %v775_v58 = vadd.f32 %v457_v27, %v425_v53  ;;  %v2592_v1 = vadd.f32 %v770_v49, %v738_v45  ;;  %v461_v45 = vld [vmem:[%s2127_s24 + $0xe8] sm:$0xff] }
 0x162   : > { %v736_v13 = vsel %vm705_vm4, %v2336_v3, %v602_v14  ;;  %v737_v20 = vsel %vm705_vm4, %v2338_v4, %v603_v32  ;;  %vm704_vm6 = vcmp.eq.s32.totalorder %v674_v48, 1  ;;  %v773_v32 = vadd.f32 %v455_v9, %v423_v40  ;;  %v429_v9 = vld [vmem:[%s2330_s14 + $0xe8] sm:$0xff] }
 0x163   : > { %v734_v7 = vsel %vm704_vm6, %v2336_v3, %v2452_v42  ;;  %v735_v50 = vsel %vm704_vm6, %v2338_v4, %v601_v41  ;;  %v2547_v8 = vadd.f32 %v768_v51, %v736_v13  ;;  %v2549_v11 = vadd.f32 %v769_v47, %v737_v20  ;;  %v456_v42 = vld [vmem:[%s2127_s24 + $0xc0] sm:$0xff]  ;;  %v454_v41 = vld [vmem:[%s2127_s24 + $0xb0] sm:$0xff]  ;;  %v689_v47 = vpop.permute.xlu2 %688  ;;  %v427_v20 = vld [vmem:[%s2330_s14 + $0xd8] sm:$0xff] }
 0x164   : > { %v2557_v55 = vadd.f32 %v766_v44, %v734_v7  ;;  %v2559_v26 = vadd.f32 %v767_v59, %v735_v50  ;;  %v774_v14 = vadd.f32 %v456_v42, %v424_v12  ;;  %v776_v44 = vadd.f32 %v458_v23, %v426_v2  ;;  %v459_v2 = vld [vmem:[%s2127_s24 + $0xd8] sm:$0xff]  ;;  %v430_v23 = vld [vmem:[%s2330_s14 + $0xf0] sm:$0xff] }
 0x165   : > { %v841_v38 = vadd.f32 %v2549_v11, %v2547_v8  ;;  %v772_v59 = vadd.f32 %v454_v41, %v422_v28  ;;  %v609_v48 = vsel %vm573_vm7, %v2342_v6, 0.0  ;;  %v2594_v13 = vadd.f32 %v771_v30, %v739_v19  ;;  %v463_v30 = vld [vmem:[%s2127_s24 + $0xf8] sm:$0xff] }
 0x166   : > { %v838_v51 = vadd.f32 %v2559_v26, %v2557_v55  ;;  %vm709_vm11 = vcmp.eq.s32.totalorder %v689_v47, 1  ;;  %v610_v42 = vsel %vm574_vm9, %v2340_v5, 0.0  ;;  %v615_v47 = vsel %vm576_vm13, %v2342_v6, 0.0 }
 0x167   : > { %836 = vadd.xlane.f32.xlu2 %v835_v39  ;;  %v611_v39 = vsel %vm574_vm9, %v2342_v6, 0.0  ;;  %v844_v41 = vadd.f32 %v2594_v13, %v2592_v1  ;;  %v744_v19 = vsel %vm709_vm11, %v2336_v3, %v610_v42 }
 0x168   : > { %839 = vadd.xlane.f32.xlu0 %v838_v51  ;;  %v686_v29 = vpop.permute.xlu1 %685  ;;  %842 = vadd.xlane.f32.xlu1 %v841_v38  ;;  %v777_v38 = vadd.f32 %v459_v2, %v427_v20  ;;  %v745_v51 = vsel %vm709_vm11, %v2338_v4, %v611_v39  ;;  %v2645_v20 = vadd.f32 %v776_v44, %v744_v19 }
 0x169   : > { %vm708_vm10 = vcmp.eq.s32.totalorder %v686_v29, 1  ;;  %v683_v0 = vpop.permute.xlu0 %682  ;;  %v614_v29 = vsel %vm576_vm13, %v2340_v5, 0.0 }
 0x16a   : > { %v742_v7 = vsel %vm708_vm10, %v2336_v3, %v608_v52  ;;  %v743_v22 = vsel %vm708_vm10, %v2338_v4, %v609_v48  ;;  %vm707_vm12 = vcmp.eq.s32.totalorder %v683_v0, 1  ;;  %v612_v52 = vsel %vm575_vm8, %v2340_v5, 0.0 }
 0x16b   : > { %v740_v50 = vsel %vm707_vm12, %v2336_v3, %v2526_v46  ;;  %v741_v12 = vsel %vm707_vm12, %v2338_v4, %v607_v43  ;;  %v2603_v49 = vadd.f32 %v774_v14, %v742_v7  ;;  %v2605_v53 = vadd.f32 %v775_v58, %v743_v22  ;;  %v462_v46 = vld [vmem:[%s2127_s24 + $0xf0] sm:$0xff]  ;;  %v460_v43 = vld [vmem:[%s2127_s24 + $0xe0] sm:$0xff] }
 0x16c   : > { %v2612_v27 = vadd.f32 %v772_v59, %v740_v50  ;;  %v2614_v28 = vadd.f32 %v773_v32, %v741_v12  ;;  %v780_v14 = vadd.f32 %v462_v46, %v430_v23  ;;  %v781_v58 = vadd.f32 %v463_v30, %v431_v25 }
 0x16d   : > { %v850_v40 = vadd.f32 %v2605_v53, %v2603_v49  ;;  %v778_v32 = vadd.f32 %v460_v43, %v428_v31  ;;  %v779_v48 = vadd.f32 %v461_v45, %v429_v9  ;;  %v2647_v2 = vadd.f32 %v777_v38, %v745_v51 }
 0x16e   : > { %v847_v21 = vadd.f32 %v2614_v28, %v2612_v27  ;;  %v613_v7 = vsel %vm575_vm8, %v2342_v6, 0.0 }
 0x16f   : > { %845 = vadd.xlane.f32.xlu2 %v844_v41  ;;  %v853_v6 = vadd.f32 %v2647_v2, %v2645_v20 }
 0x170   : > { %848 = vadd.xlane.f32.xlu0 %v847_v21  ;;  %v695_v59 = vpop.permute.xlu1 %694  ;;  %851 = vadd.xlane.f32.xlu1 %v850_v40 }
 0x171   : > { %vm711_vm14 = vcmp.eq.s32.totalorder %v695_v59, 1  ;;  %v692_v0 = vpop.permute.xlu0 %691 }
 0x172   : > { %v748_v5 = vsel %vm711_vm14, %v2336_v3, %v614_v29  ;;  %v749_v22 = vsel %vm711_vm14, %v2338_v4, %v615_v47  ;;  %vm710_vm15 = vcmp.eq.s32.totalorder %v692_v0, 1 }
 0x173   : > { %v746_v50 = vsel %vm710_vm15, %v2336_v3, %v612_v52  ;;  %v747_v33 = vsel %vm710_vm15, %v2338_v4, %v613_v7  ;;  %v2656_v12 = vadd.f32 %v780_v14, %v748_v5  ;;  %v2658_v23 = vadd.f32 %v781_v58, %v749_v22 }
 0x174   : > { %v2660_v44 = vadd.f32 %v778_v32, %v746_v50  ;;  %v2662_v25 = vadd.f32 %v779_v48, %v747_v33  ;;  %v1972_v3 = vmov 256.0  }
 0x175   : > { %v859_v56 = vadd.f32 %v2658_v23, %v2656_v12  ;;  %1686 = vrcp.f32 %v1972_v3 }
 0x176   : > { %v856_v42 = vadd.f32 %v2662_v25, %v2660_v44 }
 0x177   : > { %854 = vadd.xlane.f32.xlu2 %v853_v6 }
 0x178   : > { %857 = vadd.xlane.f32.xlu0 %v856_v42  ;;  %860 = vadd.xlane.f32.xlu1 %v859_v56 }
 0x17b   : > { %v1687_v4 = vpop.eup %1686 }
 0x17c   : > { %v863_v46 = vmul.f32 256.0, %v1687_v4  ;;  %vm867_vm0 = vweird.f32 %v1687_v4 }
 0x17e   : > { %v864_v30 = vsub.f32 1.0, %v863_v46 }
 0x180   : > { %v865_v31 = vmul.f32 %v1687_v4, %v864_v30 }
 0x182   : > { %v866_v38 = vadd.f32 %v1687_v4, %v865_v31 }
 0x184   : > { %v2670_v39 = vsel %vm867_vm0, %v1687_v4, %v866_v38 }
 0x1aa   : > { %v819_v40 = vpop.xlane.xlu0 %818 }
 0x1ab   : > { %v870_v41 = vmul.f32 %v2670_v39, %v819_v40 }
 0x1ad   : > { %v2674_v9 = vsub.f32 %v2352_v16, %v870_v41  ;;  %v2677_v43 = vsub.f32 %v2354_v17, %v870_v41 }
 0x1af   : > { %v919_v45 = vmul.f32 %v2674_v9, %v2674_v9  ;;  %v920_v19 = vmul.f32 %v2677_v43, %v2677_v43 }
 0x1b1   : > { %v952_v51 = vadd.f32 %v920_v19, %v919_v45 }
 0x1b3   : > { %953 = vadd.xlane.f32.xlu0 %v952_v51 }
 0x1c2   : > { %v816_v21 = vpop.xlane.xlu2 %815 }
 0x1c3   : > { %v869_v14 = vmul.f32 %v2670_v39, %v816_v21 }
 0x1c5   : > { %v2685_v58 = vsub.f32 %v2379_v36, %v869_v14  ;;  %v2688_v16 = vsub.f32 %v2381_v37, %v869_v14 }
 0x1c7   : > { %v917_v17 = vmul.f32 %v2685_v58, %v2685_v58  ;;  %v918_v52 = vmul.f32 %v2688_v16, %v2688_v16 }
 0x1c9   : > { %v949_v29 = vadd.f32 %v918_v52, %v917_v17 }
 0x1ca   : > { %v825_v59 = vpop.xlane.xlu2 %824 }
 0x1cb   : > { %v872_v32 = vmul.f32 %v2670_v39, %v825_v59  ;;  %950 = vadd.xlane.f32.xlu2 %v949_v29  ;;  %v822_v48 = vpop.xlane.xlu1 %821 }
 0x1cc   : > { %v871_v47 = vmul.f32 %v2670_v39, %v822_v48 }
 0x1cd   : > { %v2697_v36 = vsub.f32 %v2427_v15, %v872_v32  ;;  %v2700_v37 = vsub.f32 %v2429_v18, %v872_v32 }
 0x1ce   : > { %v2703_v0 = vsub.f32 %v2440_v34, %v871_v47  ;;  %v2706_v7 = vsub.f32 %v2442_v35, %v871_v47 }
 0x1cf   : > { %v923_v5 = vmul.f32 %v2697_v36, %v2697_v36  ;;  %v924_v22 = vmul.f32 %v2700_v37, %v2700_v37 }
 0x1d0   : > { %v921_v50 = vmul.f32 %v2703_v0, %v2703_v0  ;;  %v922_v15 = vmul.f32 %v2706_v7, %v2706_v7 }
 0x1d1   : > { %v958_v18 = vadd.f32 %v924_v22, %v923_v5 }
 0x1d2   : > { %v828_v33 = vpop.xlane.xlu2 %827  ;;  %v955_v6 = vadd.f32 %v922_v15, %v921_v50 }
 0x1d3   : > { %v831_v56 = vpop.xlane.xlu0 %830  ;;  %v873_v34 = vmul.f32 %v2670_v39, %v828_v33  ;;  %959 = vadd.xlane.f32.xlu2 %v958_v18  ;;  %v834_v35 = vpop.xlane.xlu1 %833 }
 0x1d4   : > { %v874_v42 = vmul.f32 %v2670_v39, %v831_v56  ;;  %v875_v3 = vmul.f32 %v2670_v39, %v834_v35  ;;  %956 = vadd.xlane.f32.xlu1 %v955_v6 }
 0x1d5   : > { %v2720_v4 = vsub.f32 %v2470_v61, %v873_v34  ;;  %v2723_v46 = vsub.f32 %v2472_v62, %v873_v34 }
 0x1d6   : > { %v2726_v30 = vsub.f32 %v2494_v24, %v874_v42  ;;  %v2729_v31 = vsub.f32 %v2496_v54, %v874_v42  ;;  %v2732_v38 = vsub.f32 %v2484_v57, %v875_v3  ;;  %v2735_v40 = vsub.f32 %v2486_v10, %v875_v3 }
 0x1d7   : > { %v925_v61 = vmul.f32 %v2720_v4, %v2720_v4  ;;  %v926_v62 = vmul.f32 %v2723_v46, %v2723_v46 }
 0x1d8   : > { %v927_v41 = vmul.f32 %v2726_v30, %v2726_v30  ;;  %v928_v24 = vmul.f32 %v2729_v31, %v2729_v31  ;;  %v929_v54 = vmul.f32 %v2732_v38, %v2732_v38  ;;  %v930_v57 = vmul.f32 %v2735_v40, %v2735_v40 }
 0x1d9   : > { %v961_v10 = vadd.f32 %v926_v62, %v925_v61 }
 0x1da   : > { %v837_v45 = vpop.xlane.xlu2 %836  ;;  %v964_v19 = vadd.f32 %v928_v24, %v927_v41  ;;  %v967_v14 = vadd.f32 %v930_v57, %v929_v54 }
 0x1db   : > { %v840_v51 = vpop.xlane.xlu0 %839  ;;  %v876_v21 = vmul.f32 %v2670_v39, %v837_v45  ;;  %962 = vadd.xlane.f32.xlu0 %v961_v10  ;;  %v843_v17 = vpop.xlane.xlu1 %842 }
 0x1dc   : > { %v877_v52 = vmul.f32 %v2670_v39, %v840_v51  ;;  %v878_v29 = vmul.f32 %v2670_v39, %v843_v17  ;;  %965 = vadd.xlane.f32.xlu1 %v964_v19  ;;  %968 = vadd.xlane.f32.xlu2 %v967_v14 }
 0x1dd   : > { %v2753_v59 = vsub.f32 %v2535_v60, %v876_v21  ;;  %v2756_v32 = vsub.f32 %v2537_v63, %v876_v21 }
 0x1de   : > { %v2759_v48 = vsub.f32 %v2557_v55, %v877_v52  ;;  %v2762_v47 = vsub.f32 %v2559_v26, %v877_v52  ;;  %v2765_v5 = vsub.f32 %v2547_v8, %v878_v29  ;;  %v2768_v22 = vsub.f32 %v2549_v11, %v878_v29 }
 0x1df   : > { %v931_v60 = vmul.f32 %v2753_v59, %v2753_v59  ;;  %v932_v63 = vmul.f32 %v2756_v32, %v2756_v32 }
 0x1e0   : > { %v933_v50 = vmul.f32 %v2759_v48, %v2759_v48  ;;  %v934_v55 = vmul.f32 %v2762_v47, %v2762_v47  ;;  %v935_v26 = vmul.f32 %v2765_v5, %v2765_v5  ;;  %v936_v8 = vmul.f32 %v2768_v22, %v2768_v22 }
 0x1e1   : > { %v970_v11 = vadd.f32 %v932_v63, %v931_v60 }
 0x1e2   : > { %v846_v15 = vpop.xlane.xlu2 %845  ;;  %v973_v18 = vadd.f32 %v934_v55, %v933_v50  ;;  %v976_v34 = vadd.f32 %v936_v8, %v935_v26 }
 0x1e3   : > { %v849_v33 = vpop.xlane.xlu0 %848  ;;  %v879_v56 = vmul.f32 %v2670_v39, %v846_v15  ;;  %971 = vadd.xlane.f32.xlu0 %v970_v11  ;;  %v852_v6 = vpop.xlane.xlu1 %851 }
 0x1e4   : > { %v880_v35 = vmul.f32 %v2670_v39, %v849_v33  ;;  %v881_v42 = vmul.f32 %v2670_v39, %v852_v6  ;;  %974 = vadd.xlane.f32.xlu1 %v973_v18  ;;  %977 = vadd.xlane.f32.xlu2 %v976_v34 }
 0x1e5   : > { %v2786_v3 = vsub.f32 %v2592_v1, %v879_v56  ;;  %v2789_v61 = vsub.f32 %v2594_v13, %v879_v56 }
 0x1e6   : > { %v2792_v62 = vsub.f32 %v2612_v27, %v880_v35  ;;  %v2795_v41 = vsub.f32 %v2614_v28, %v880_v35  ;;  %v2798_v24 = vsub.f32 %v2603_v49, %v881_v42  ;;  %v2801_v54 = vsub.f32 %v2605_v53, %v881_v42 }
 0x1e7   : > { %v937_v1 = vmul.f32 %v2786_v3, %v2786_v3  ;;  %v938_v13 = vmul.f32 %v2789_v61, %v2789_v61 }
 0x1e8   : > { %v939_v57 = vmul.f32 %v2792_v62, %v2792_v62  ;;  %v940_v27 = vmul.f32 %v2795_v41, %v2795_v41  ;;  %v941_v28 = vmul.f32 %v2798_v24, %v2798_v24  ;;  %v942_v49 = vmul.f32 %v2801_v54, %v2801_v54 }
 0x1e9   : > { %v979_v53 = vadd.f32 %v938_v13, %v937_v1  ;;  %v1221_v1 = vld [vmem:[%s3228_s5] sm:$0x3] }
 0x1ea   : > { %v855_v10 = vpop.xlane.xlu2 %854  ;;  %v982_v45 = vadd.f32 %v940_v27, %v939_v57  ;;  %v985_v21 = vadd.f32 %v942_v49, %v941_v28  ;;  %v1259_v57 = vld [vmem:[%s3229_s6] sm:$0x3]  ;;  %v2855_v28 = vperm.slane %v1221_v1, 0  ;;  %v2857_v49 = vperm.slane %v1221_v1, 1 }
 0x1eb   : > { %v858_v19 = vpop.xlane.xlu0 %857  ;;  %v882_v51 = vmul.f32 %v2670_v39, %v855_v10  ;;  %980 = vadd.xlane.f32.xlu0 %v979_v53  ;;  %v861_v14 = vpop.xlane.xlu1 %860  ;;  %v2859_v10 = vperm.slane %v1259_v57, 0 }
 0x1ec   : > { %v883_v17 = vmul.f32 %v2670_v39, %v858_v19  ;;  %v884_v52 = vmul.f32 %v2670_v39, %v861_v14  ;;  %983 = vadd.xlane.f32.xlu1 %v982_v45  ;;  %986 = vadd.xlane.f32.xlu2 %v985_v21  ;;  %v2861_v45 = vperm.slane %v1259_v57, 1 }
 0x1ed   : > { %v2819_v29 = vsub.f32 %v2645_v20, %v882_v51  ;;  %v2822_v60 = vsub.f32 %v2647_v2, %v882_v51 }
 0x1ee   : > { %v2825_v63 = vsub.f32 %v2660_v44, %v883_v17  ;;  %v2828_v50 = vsub.f32 %v2662_v25, %v883_v17  ;;  %v2831_v55 = vsub.f32 %v2656_v12, %v884_v52  ;;  %v2834_v26 = vsub.f32 %v2658_v23, %v884_v52 }
 0x1ef   : > { %v943_v20 = vmul.f32 %v2819_v29, %v2819_v29  ;;  %v944_v2 = vmul.f32 %v2822_v60, %v2822_v60 }
 0x1f0   : > { %v945_v8 = vmul.f32 %v2825_v63, %v2825_v63  ;;  %v946_v44 = vmul.f32 %v2828_v50, %v2828_v50  ;;  %v947_v25 = vmul.f32 %v2831_v55, %v2831_v55  ;;  %v948_v12 = vmul.f32 %v2834_v26, %v2834_v26 }
 0x1f1   : > { %v988_v23 = vadd.f32 %v944_v2, %v943_v20 }
 0x1f2   : > { %v991_v11 = vadd.f32 %v946_v44, %v945_v8  ;;  %v994_v15 = vadd.f32 %v948_v12, %v947_v25 }
 0x1f3   : > { %989 = vadd.xlane.f32.xlu0 %v988_v23 }
 0x1f4   : > { %992 = vadd.xlane.f32.xlu1 %v991_v11  ;;  %995 = vadd.xlane.f32.xlu2 %v994_v15 }
 0x226   : > { %v954_v18 = vpop.xlane.xlu0 %953 }
 0x227   : > { %v998_v33 = vmul.f32 %v954_v18, %v2670_v39 }
 0x229   : > { %v1014_v56 = vadd.f32 1e-12, %v998_v33 }
 0x22b   : > { %1688 = vrsqrt.f32 %v1014_v56  ;;  %vm1045_vm2 = vweird.f32 %v1014_v56 }
 0x231   : > { %v1689_v34 = vpop.eup %1688 }
 0x232   : > { %v1040_v6 = vmul.f32 %v1689_v34, %v1014_v56  ;;  %vm1046_vm1 = vweird.f32 %v1689_v34 }
 0x233   : > { %vm1047_vm3 = vmor %vm1045_vm2, %vm1046_vm1 }
 0x234   : > { %v1041_v35 = vmul.f32 %v1689_v34, %v1040_v6 }
 0x236   : > { %v1042_v42 = vmul.f32 0.5, %v1041_v35 }
 0x238   : > { %v1043_v13 = vsub.f32 1.5, %v1042_v42 }
 0x23a   : > { %v1044_v27 = vmul.f32 %v1689_v34, %v1043_v13 }
 0x23c   : > { %v1048_v53 = vsel %vm1047_vm3, %v1689_v34, %v1044_v27 }
 0x23d   : > { %v1191_v19 = vmul.f32 %v1048_v53, %v2674_v9  ;;  %v1192_v51 = vmul.f32 %v1048_v53, %v2677_v43 }
 0x23e   : > { %v951_v21 = vpop.xlane.xlu2 %950 }
 0x23f   : > { %v1229_v14 = vmul.f32 %v2855_v28, %v1191_v19  ;;  %v1230_v17 = vmul.f32 %v2857_v49, %v1192_v51  ;;  %v997_v52 = vmul.f32 %v951_v21, %v2670_v39 }
 0x241   : > { %v1267_v20 = vadd.f32 %v2859_v10, %v1229_v14  ;;  %v1268_v2 = vadd.f32 %v2861_v45, %v1230_v17  ;;  %v1013_v8 = vadd.f32 1e-12, %v997_v52 }
 0x243   : > { %1299 = vst [vmem:[%s2150_s0 + $0x10] sm:$0xff] %v1267_v20  ;;  %1690 = vrsqrt.f32 %v1013_v8  ;;  %vm1035_vm5 = vweird.f32 %v1013_v8 }
 0x244   : > { %1300 = vst [vmem:[%s2150_s0 + $0x18] sm:$0xff] %v1268_v2 }
 0x246   : > { %v960_v44 = vpop.xlane.xlu2 %959 }
 0x247   : > { %v1000_v9 = vmul.f32 %v960_v44, %v2670_v39  ;;  %v957_v25 = vpop.xlane.xlu1 %956 }
 0x248   : > { %v999_v12 = vmul.f32 %v957_v25, %v2670_v39 }
 0x249   : > { %v1691_v43 = vpop.eup %1690  ;;  %v1016_v23 = vadd.f32 1e-12, %v1000_v9 }
 0x24a   : > { %v1030_v11 = vmul.f32 %v1691_v43, %v1013_v8  ;;  %v2874_v15 = vadd.f32 1e-12, %v999_v12  ;;  %vm1036_vm4 = vweird.f32 %v1691_v43 }
 0x24b   : > { %1692 = vrsqrt.f32 %v1016_v23  ;;  %vm1037_vm6 = vmor %vm1035_vm5, %vm1036_vm4  ;;  %vm1065_vm7 = vweird.f32 %v1016_v23 }
 0x24c   : > { %v1031_v18 = vmul.f32 %v1691_v43, %v1030_v11  ;;  %1694 = vrsqrt.f32 %v2874_v15  ;;  %vm1055_vm10 = vweird.f32 %v2874_v15 }
 0x24e   : > { %v1032_v33 = vmul.f32 0.5, %v1031_v18  ;;  %v963_v56 = vpop.xlane.xlu0 %962 }
 0x24f   : > { %v1001_v34 = vmul.f32 %v963_v56, %v2670_v39  ;;  %v966_v35 = vpop.xlane.xlu1 %965  ;;  %v969_v42 = vpop.xlane.xlu2 %968 }
 0x250   : > { %v1033_v6 = vsub.f32 1.5, %v1032_v33  ;;  %v1002_v13 = vmul.f32 %v966_v35, %v2670_v39  ;;  %v1003_v27 = vmul.f32 %v969_v42, %v2670_v39 }
 0x251   : > { %v1693_v1 = vpop.eup %1692  ;;  %v2879_v57 = vadd.f32 1e-12, %v1001_v34 }
 0x252   : > { %v1034_v53 = vmul.f32 %v1691_v43, %v1033_v6  ;;  %v1060_v19 = vmul.f32 %v1693_v1, %v1016_v23  ;;  %v1695_v51 = vpop.eup %1694  ;;  %v2882_v21 = vadd.f32 1e-12, %v1002_v13  ;;  %v2885_v14 = vadd.f32 1e-12, %v1003_v27 }
 0x253   : > { %1696 = vrsqrt.f32 %v2879_v57  ;;  %v1050_v52 = vmul.f32 %v1695_v51, %v2874_v15  ;;  %vm1066_vm8 = vweird.f32 %v1693_v1  ;;  %vm1056_vm9 = vweird.f32 %v1695_v51 }
 0x254   : > { %v1038_v17 = vsel %vm1037_vm6, %v1691_v43, %v1034_v53  ;;  %v1061_v20 = vmul.f32 %v1693_v1, %v1060_v19  ;;  %1698 = vrsqrt.f32 %v2882_v21  ;;  %vm1067_vm11 = vmor %vm1065_vm7, %vm1066_vm8  ;;  %vm1075_vm12 = vweird.f32 %v2879_v57 }
 0x255   : > { %v1189_v2 = vmul.f32 %v1038_v17, %v2685_v58  ;;  %v1190_v44 = vmul.f32 %v1038_v17, %v2688_v16  ;;  %v1051_v8 = vmul.f32 %v1695_v51, %v1050_v52  ;;  %1700 = vrsqrt.f32 %v2885_v14  ;;  %vm1057_vm15 = vmor %vm1055_vm10, %vm1056_vm9 }
 0x256   : > { %v1062_v9 = vmul.f32 0.5, %v1061_v20  ;;  %v972_v25 = vpop.xlane.xlu0 %971  ;;  %vm1085_vm13 = vweird.f32 %v2882_v21  ;;  %vm1095_vm0 = vweird.f32 %v2885_v14 }
 0x257   : > { %v1227_v12 = vmul.f32 %v2855_v28, %v1189_v2  ;;  %v1228_v11 = vmul.f32 %v2857_v49, %v1190_v44  ;;  %v1004_v43 = vmul.f32 %v972_v25, %v2670_v39  ;;  %v1052_v18 = vmul.f32 0.5, %v1051_v8  ;;  %v975_v58 = vpop.xlane.xlu1 %974  ;;  %v978_v17 = vpop.xlane.xlu2 %977 }
 0x258   : > { %v1063_v33 = vsub.f32 1.5, %v1062_v9  ;;  %v1005_v6 = vmul.f32 %v975_v58, %v2670_v39 }
 0x259   : > { %v2895_v16 = vpop.eup %1696  ;;  %v1265_v56 = vadd.f32 %v2859_v10, %v1227_v12  ;;  %v1266_v34 = vadd.f32 %v2861_v45, %v1228_v11  ;;  %v2900_v35 = vadd.f32 1e-12, %v1004_v43  ;;  %v1053_v42 = vsub.f32 1.5, %v1052_v18 }
 0x25a   : > { %v1064_v13 = vmul.f32 %v1693_v1, %v1063_v33  ;;  %v1070_v27 = vmul.f32 %v2895_v16, %v2879_v57  ;;  %v2904_v53 = vpop.eup %1698  ;;  %v2910_v19 = vadd.f32 1e-12, %v1005_v6  ;;  %vm1076_vm14 = vweird.f32 %v2895_v16 }
 0x25b   : > { %1297 = vst [vmem:[%s2150_s0] sm:$0xff] %v1265_v56  ;;  %1702 = vrsqrt.f32 %v2900_v35  ;;  %v2913_v52 = vpop.eup %1700  ;;  %v1054_v20 = vmul.f32 %v1695_v51, %v1053_v42  ;;  %v1080_v44 = vmul.f32 %v2904_v53, %v2882_v21  ;;  %v1006_v12 = vmul.f32 %v978_v17, %v2670_v39  ;;  %vm1077_vm4 = vmor %vm1075_vm12, %vm1076_vm14 }
 0x25c   : > { %1298 = vst [vmem:[%s2150_s0 + $0x8] sm:$0xff] %v1266_v34  ;;  %v1068_v2 = vsel %vm1067_vm11, %v1693_v1, %v1064_v13  ;;  %v1071_v8 = vmul.f32 %v2895_v16, %v1070_v27  ;;  %v1090_v9 = vmul.f32 %v2913_v52, %v2885_v14  ;;  %1704 = vrsqrt.f32 %v2910_v19 }
 0x25d   : > { %v1195_v23 = vmul.f32 %v1068_v2, %v2697_v36  ;;  %v1196_v15 = vmul.f32 %v1068_v2, %v2700_v37  ;;  %v1058_v25 = vsel %vm1057_vm15, %v1695_v51, %v1054_v20  ;;  %v1081_v1 = vmul.f32 %v2904_v53, %v1080_v44 }
 0x25e   : > { %v1193_v11 = vmul.f32 %v1058_v25, %v2703_v0  ;;  %v1194_v36 = vmul.f32 %v1058_v25, %v2706_v7  ;;  %vm1086_vm1 = vweird.f32 %v2904_v53  ;;  %v1072_v51 = vmul.f32 0.5, %v1071_v8  ;;  %v981_v21 = vpop.xlane.xlu0 %980 }
 0x25f   : > { %v1233_v37 = vmul.f32 %v2855_v28, %v1195_v23  ;;  %v1234_v43 = vmul.f32 %v2857_v49, %v1196_v15  ;;  %v1082_v18 = vmul.f32 0.5, %v1081_v1  ;;  %v1091_v33 = vmul.f32 %v2913_v52, %v1090_v9  ;;  %vm1087_vm5 = vmor %vm1085_vm13, %vm1086_vm1  ;;  %v984_v57 = vpop.xlane.xlu1 %983 }
 0x260   : > { %v1231_v56 = vmul.f32 %v2855_v28, %v1193_v11  ;;  %v1232_v0 = vmul.f32 %v2857_v49, %v1194_v36  ;;  %v1073_v42 = vsub.f32 1.5, %v1072_v51  ;;  %vm1105_vm2 = vweird.f32 %v2900_v35 }
 0x261   : > { %v2936_v58 = vpop.eup %1702  ;;  %v1271_v7 = vadd.f32 %v2859_v10, %v1233_v37  ;;  %v1272_v34 = vadd.f32 %v2861_v45, %v1234_v43  ;;  %v1083_v6 = vsub.f32 1.5, %v1082_v18  ;;  %v1092_v13 = vmul.f32 0.5, %v1091_v33  ;;  %v987_v37 = vpop.xlane.xlu2 %986 }
 0x262   : > { %v1100_v27 = vmul.f32 %v2936_v58, %v2900_v35  ;;  %v1269_v17 = vadd.f32 %v2859_v10, %v1231_v56  ;;  %v1270_v20 = vadd.f32 %v2861_v45, %v1232_v0  ;;  %vm1096_vm3 = vweird.f32 %v2913_v52  ;;  %v2951_v44 = vpop.eup %1704 }
 0x263   : > { %1303 = vst [vmem:[%s2150_s0 + $0x30] sm:$0xff] %v1271_v7  ;;  %v2949_v2 = vadd.f32 1e-12, %v1006_v12  ;;  %v1084_v23 = vmul.f32 %v2904_v53, %v1083_v6  ;;  %v1074_v15 = vmul.f32 %v2895_v16, %v1073_v42  ;;  %v1093_v8 = vsub.f32 1.5, %v1092_v13  ;;  %vm1097_vm8 = vmor %vm1095_vm0, %vm1096_vm3 }
 0x264   : > { %1304 = vst [vmem:[%s2150_s0 + $0x38] sm:$0xff] %v1272_v34  ;;  %v1101_v9 = vmul.f32 %v2936_v58, %v1100_v27  ;;  %v1110_v25 = vmul.f32 %v2951_v44, %v2910_v19  ;;  %vm1116_vm6 = vweird.f32 %v2951_v44  ;;  %vm1106_vm7 = vweird.f32 %v2936_v58 }
 0x265   : > { %1301 = vst [vmem:[%s2150_s0 + $0x20] sm:$0xff] %v1269_v17  ;;  %1706 = vrsqrt.f32 %v2949_v2  ;;  %v1088_v1 = vsel %vm1087_vm5, %v2904_v53, %v1084_v23  ;;  %v1078_v12 = vsel %vm1077_vm4, %v2895_v16, %v1074_v15  ;;  %v1094_v11 = vmul.f32 %v2913_v52, %v1093_v8  ;;  %vm1107_vm9 = vmor %vm1105_vm2, %vm1106_vm7 }
 0x266   : > { %1302 = vst [vmem:[%s2150_s0 + $0x28] sm:$0xff] %v1270_v20  ;;  %v1102_v36 = vmul.f32 0.5, %v1101_v9  ;;  %v1199_v43 = vmul.f32 %v1088_v1, %v2726_v30  ;;  %v1200_v18 = vmul.f32 %v1088_v1, %v2729_v31  ;;  %v1197_v51 = vmul.f32 %v1078_v12, %v2720_v4 }
 0x267   : > { %v1198_v33 = vmul.f32 %v1078_v12, %v2723_v46  ;;  %v1098_v16 = vsel %vm1097_vm8, %v2913_v52, %v1094_v11  ;;  %v1111_v53 = vmul.f32 %v2951_v44, %v1110_v25  ;;  %v1008_v0 = vmul.f32 %v984_v57, %v2670_v39  ;;  %v993_v12 = vpop.xlane.xlu1 %992 }
 0x268   : > { %v1103_v56 = vsub.f32 1.5, %v1102_v36  ;;  %v1237_v30 = vmul.f32 %v2855_v28, %v1199_v43  ;;  %v1238_v31 = vmul.f32 %v2857_v49, %v1200_v18  ;;  %v1235_v4 = vmul.f32 %v2855_v28, %v1197_v51  ;;  %v990_v43 = vpop.xlane.xlu0 %989 }
 0x269   : > { %v1236_v46 = vmul.f32 %v2857_v49, %v1198_v33  ;;  %v1201_v7 = vmul.f32 %v1098_v16, %v2732_v38  ;;  %v1202_v14 = vmul.f32 %v1098_v16, %v2735_v40  ;;  %v1112_v34 = vmul.f32 0.5, %v1111_v53  ;;  %v996_v18 = vpop.xlane.xlu2 %995 }
 0x26a   : > { %v1104_v52 = vmul.f32 %v2936_v58, %v1103_v56  ;;  %v1275_v42 = vadd.f32 %v2859_v10, %v1237_v30  ;;  %v1276_v13 = vadd.f32 %v2861_v45, %v1238_v31  ;;  %v1273_v27 = vadd.f32 %v2859_v10, %v1235_v4 }
 0x26b   : > { %v2993_v6 = vpop.eup %1706  ;;  %v1274_v17 = vadd.f32 %v2861_v45, %v1236_v46  ;;  %v1239_v38 = vmul.f32 %v2855_v28, %v1201_v7  ;;  %v1240_v40 = vmul.f32 %v2857_v49, %v1202_v14  ;;  %v1113_v20 = vsub.f32 1.5, %v1112_v34 }
 0x26c   : > { %v1108_v23 = vsel %vm1107_vm9, %v2936_v58, %v1104_v52  ;;  %1307 = vst [vmem:[%s2150_s0 + $0x50] sm:$0xff] %v1275_v42  ;;  %vm1115_vm10 = vweird.f32 %v2910_v19  ;;  %v1120_v35 = vmul.f32 %v2993_v6, %v2949_v2  ;;  %v3016_v58 = vadd.f32 1e-12, %v1008_v0 }
 0x26d   : > { %v1203_v15 = vmul.f32 %v1108_v23, %v2753_v59  ;;  %v1204_v8 = vmul.f32 %v1108_v23, %v2756_v32  ;;  %1308 = vst [vmem:[%s2150_s0 + $0x58] sm:$0xff] %v1276_v13  ;;  %v1277_v9 = vadd.f32 %v2859_v10, %v1239_v38  ;;  %v1278_v25 = vadd.f32 %v2861_v45, %v1240_v40  ;;  %vm1117_vm11 = vmor %vm1115_vm10, %vm1116_vm6 }
 0x26e   : > { %v1114_v57 = vmul.f32 %v2951_v44, %v1113_v20  ;;  %1305 = vst [vmem:[%s2150_s0 + $0x40] sm:$0xff] %v1273_v27  ;;  %v1121_v19 = vmul.f32 %v2993_v6, %v1120_v35  ;;  %v1007_v1 = vmul.f32 %v981_v21, %v2670_v39  ;;  %1708 = vrsqrt.f32 %v3016_v58 }
 0x26f   : > { %v1241_v59 = vmul.f32 %v2855_v28, %v1203_v15  ;;  %v1242_v32 = vmul.f32 %v2857_v49, %v1204_v8  ;;  %1306 = vst [vmem:[%s2150_s0 + $0x48] sm:$0xff] %v1274_v17  ;;  %v1009_v36 = vmul.f32 %v987_v37, %v2670_v39  ;;  %v1011_v37 = vmul.f32 %v993_v12, %v2670_v39 }
 0x270   : > { %v1118_v11 = vsel %vm1117_vm11, %v2951_v44, %v1114_v57  ;;  %1309 = vst [vmem:[%s2150_s0 + $0x60] sm:$0xff] %v1277_v9  ;;  %v1122_v53 = vmul.f32 0.5, %v1121_v19  ;;  %v3035_v44 = vadd.f32 1e-12, %v1007_v1  ;;  %vm1126_vm12 = vweird.f32 %v2993_v6 }
 0x271   : > { %v1205_v51 = vmul.f32 %v1118_v11, %v2759_v48  ;;  %v1206_v33 = vmul.f32 %v1118_v11, %v2762_v47  ;;  %v1279_v16 = vadd.f32 %v2859_v10, %v1241_v59  ;;  %v1280_v21 = vadd.f32 %v2861_v45, %v1242_v32  ;;  %1310 = vst [vmem:[%s2150_s0 + $0x68] sm:$0xff] %v1278_v25 }
 0x272   : > { %v3037_v56 = vadd.f32 1e-12, %v1009_v36  ;;  %v1010_v48 = vmul.f32 %v990_v43, %v2670_v39  ;;  %v1012_v47 = vmul.f32 %v996_v18, %v2670_v39  ;;  %v1123_v31 = vsub.f32 1.5, %v1122_v53 }
 0x273   : > { %v1243_v0 = vmul.f32 %v2855_v28, %v1205_v51  ;;  %v1244_v30 = vmul.f32 %v2857_v49, %v1206_v33  ;;  %1311 = vst [vmem:[%s2150_s0 + $0x70] sm:$0xff] %v1279_v16  ;;  %1710 = vrsqrt.f32 %v3035_v44  ;;  %v3051_v7 = vadd.f32 1e-12, %v1011_v37 }
 0x274   : > { %1312 = vst [vmem:[%s2150_s0 + $0x78] sm:$0xff] %v1280_v21  ;;  %1712 = vrsqrt.f32 %v3037_v56  ;;  %v1709_v14 = vpop.eup %1708  ;;  %v1124_v34 = vmul.f32 %v2993_v6, %v1123_v31  ;;  %vm1125_vm13 = vweird.f32 %v2949_v2  ;;  %v3055_v39 = vadd.f32 1e-12, %v1010_v48 }
 0x275   : > { %v1281_v4 = vadd.f32 %v2859_v10, %v1243_v0  ;;  %v1282_v46 = vadd.f32 %v2861_v45, %v1244_v30  ;;  %v3057_v52 = vadd.f32 1e-12, %v1012_v47  ;;  %vm1127_vm14 = vmor %vm1125_vm13, %vm1126_vm12  ;;  %v1140_v42 = vmul.f32 %v1709_v14, %v3016_v58 }
 0x276   : > { %1714 = vrsqrt.f32 %v3051_v7  ;;  %v1128_v13 = vsel %vm1127_vm14, %v2993_v6, %v1124_v34  ;;  %vm1145_vm15 = vweird.f32 %v3016_v58  ;;  %vm1146_vm0 = vweird.f32 %v1709_v14 }
 0x277   : > { %1313 = vst [vmem:[%s2150_s0 + $0x80] sm:$0xff] %v1281_v4  ;;  %1716 = vrsqrt.f32 %v3055_v39  ;;  %v1207_v27 = vmul.f32 %v1128_v13, %v2765_v5  ;;  %v1208_v17 = vmul.f32 %v1128_v13, %v2768_v22  ;;  %v1141_v2 = vmul.f32 %v1709_v14, %v1140_v42  ;;  %vm1147_vm6 = vmor %vm1145_vm15, %vm1146_vm0 }
 0x278   : > { %1314 = vst [vmem:[%s2150_s0 + $0x88] sm:$0xff] %v1282_v46  ;;  %1718 = vrsqrt.f32 %v3057_v52  ;;  %vm1135_vm1 = vweird.f32 %v3035_v44  ;;  %vm1155_vm2 = vweird.f32 %v3037_v56  ;;  %vm1175_vm3 = vweird.f32 %v3051_v7 }
 0x279   : > { %v1711_v38 = vpop.eup %1710  ;;  %v1245_v20 = vmul.f32 %v2855_v28, %v1207_v27  ;;  %v1246_v23 = vmul.f32 %v2857_v49, %v1208_v17  ;;  %v1142_v15 = vmul.f32 0.5, %v1141_v2  ;;  %vm1165_vm5 = vweird.f32 %v3055_v39 }
 0x27a   : > { %v1713_v40 = vpop.eup %1712  ;;  %v1130_v8 = vmul.f32 %v1711_v38, %v3035_v44  ;;  %vm1136_vm4 = vweird.f32 %v1711_v38  ;;  %vm1185_vm15 = vweird.f32 %v3057_v52 }
 0x27b   : > { %v1150_v5 = vmul.f32 %v1713_v40, %v3037_v56  ;;  %v1283_v6 = vadd.f32 %v2859_v10, %v1245_v20  ;;  %v1284_v35 = vadd.f32 %v2861_v45, %v1246_v23  ;;  %v1143_v9 = vsub.f32 1.5, %v1142_v15  ;;  %vm1137_vm10 = vmor %vm1135_vm1, %vm1136_vm4 }
 0x27c   : > { %v3074_v22 = vpop.eup %1714  ;;  %v1131_v25 = vmul.f32 %v1711_v38, %v1130_v8  ;;  %vm1156_vm7 = vweird.f32 %v1713_v40 }
 0x27d   : > { %v1717_v57 = vpop.eup %1716  ;;  %v1151_v59 = vmul.f32 %v1713_v40, %v1150_v5  ;;  %v1170_v32 = vmul.f32 %v3074_v22, %v3051_v7  ;;  %1315 = vst [vmem:[%s2150_s0 + $0x90] sm:$0xff] %v1283_v6  ;;  %v1144_v1 = vmul.f32 %v1709_v14, %v1143_v9  ;;  %vm1176_vm8 = vweird.f32 %v3074_v22  ;;  %vm1157_vm12 = vmor %vm1155_vm2, %vm1156_vm7 }
 0x27e   : > { %v3082_v19 = vpop.eup %1718  ;;  %v1132_v12 = vmul.f32 0.5, %v1131_v25  ;;  %v1160_v11 = vmul.f32 %v1717_v57, %v3055_v39  ;;  %1316 = vst [vmem:[%s2150_s0 + $0x98] sm:$0xff] %v1284_v35  ;;  %vm1166_vm9 = vweird.f32 %v1717_v57  ;;  %vm1177_vm13 = vmor %vm1175_vm3, %vm1176_vm8 }
 0x27f   : > { %v1152_v36 = vmul.f32 0.5, %v1151_v59  ;;  %v1171_v43 = vmul.f32 %v3074_v22, %v1170_v32  ;;  %v1180_v18 = vmul.f32 %v3082_v19, %v3057_v52  ;;  %v1148_v51 = vsel %vm1147_vm6, %v1709_v14, %v1144_v1  ;;  %vm1167_vm14 = vmor %vm1165_vm5, %vm1166_vm9 }
 0x280   : > { %v1133_v33 = vsub.f32 1.5, %v1132_v12  ;;  %v1161_v16 = vmul.f32 %v1717_v57, %v1160_v11  ;;  %v1211_v21 = vmul.f32 %v1148_v51, %v2792_v62  ;;  %v1212_v53 = vmul.f32 %v1148_v51, %v2795_v41 }
 0x281   : > { %v1153_v58 = vsub.f32 1.5, %v1152_v36  ;;  %v1172_v37 = vmul.f32 0.5, %v1171_v43  ;;  %v1181_v48 = vmul.f32 %v3082_v19, %v1180_v18  ;;  %vm1186_vm11 = vweird.f32 %v3082_v19 }
 0x282   : > { %v1134_v0 = vmul.f32 %v1711_v38, %v1133_v33  ;;  %v1162_v30 = vmul.f32 0.5, %v1161_v16  ;;  %v1249_v47 = vmul.f32 %v2855_v28, %v1211_v21  ;;  %v1250_v31 = vmul.f32 %v2857_v49, %v1212_v53  ;;  %vm1187_vm0 = vmor %vm1185_vm15, %vm1186_vm11 }
 0x283   : > { %v1154_v4 = vmul.f32 %v1713_v40, %v1153_v58  ;;  %v1173_v46 = vsub.f32 1.5, %v1172_v37  ;;  %v1182_v14 = vmul.f32 0.5, %v1181_v48 }
 0x284   : > { %v1138_v62 = vsel %vm1137_vm10, %v1711_v38, %v1134_v0  ;;  %v1163_v41 = vsub.f32 1.5, %v1162_v30  ;;  %v1287_v34 = vadd.f32 %v2859_v10, %v1249_v47  ;;  %v1288_v42 = vadd.f32 %v2861_v45, %v1250_v31 }
 0x285   : > { %v1209_v13 = vmul.f32 %v1138_v62, %v2786_v3  ;;  %v1210_v44 = vmul.f32 %v1138_v62, %v2789_v61  ;;  %v1158_v27 = vsel %vm1157_vm12, %v1713_v40, %v1154_v4  ;;  %v1174_v17 = vmul.f32 %v3074_v22, %v1173_v46 }
 0x286   : > { %v1164_v2 = vmul.f32 %v1717_v57, %v1163_v41  ;;  %v1183_v38 = vsub.f32 1.5, %v1182_v14  ;;  %1319 = vst [vmem:[%s2150_s0 + $0xb0] sm:$0xff] %v1287_v34  ;;  %v1213_v56 = vmul.f32 %v1158_v27, %v2798_v24  ;;  %v1214_v40 = vmul.f32 %v1158_v27, %v2801_v54 }
 0x287   : > { %v1247_v3 = vmul.f32 %v2855_v28, %v1209_v13  ;;  %v1248_v61 = vmul.f32 %v2857_v49, %v1210_v44  ;;  %1320 = vst [vmem:[%s2150_s0 + $0xb8] sm:$0xff] %v1288_v42  ;;  %v1178_v7 = vsel %vm1177_vm13, %v3074_v22, %v1174_v17 }
 0x288   : > { %v1168_v20 = vsel %vm1167_vm14, %v1717_v57, %v1164_v2  ;;  %v1184_v23 = vmul.f32 %v3082_v19, %v1183_v38  ;;  %v1251_v54 = vmul.f32 %v2855_v28, %v1213_v56  ;;  %v1252_v8 = vmul.f32 %v2857_v49, %v1214_v40 }
 0x289   : > { %v1285_v15 = vadd.f32 %v2859_v10, %v1247_v3  ;;  %v1286_v24 = vadd.f32 %v2861_v45, %v1248_v61  ;;  %v1217_v39 = vmul.f32 %v1178_v7, %v2825_v63  ;;  %v1218_v5 = vmul.f32 %v1178_v7, %v2828_v50 }
 0x28a   : > { %v1215_v22 = vmul.f32 %v1168_v20, %v2819_v29  ;;  %v1216_v6 = vmul.f32 %v1168_v20, %v2822_v60  ;;  %v1289_v52 = vadd.f32 %v2859_v10, %v1251_v54  ;;  %v1290_v35 = vadd.f32 %v2861_v45, %v1252_v8 }
 0x28b   : > { %1317 = vst [vmem:[%s2150_s0 + $0xa0] sm:$0xff] %v1285_v15  ;;  %v1188_v9 = vsel %vm1187_vm0, %v3082_v19, %v1184_v23  ;;  %v1255_v63 = vmul.f32 %v2855_v28, %v1217_v39  ;;  %v1256_v50 = vmul.f32 %v2857_v49, %v1218_v5 }
 0x28c   : > { %1318 = vst [vmem:[%s2150_s0 + $0xa8] sm:$0xff] %v1286_v24  ;;  %v1253_v29 = vmul.f32 %v2855_v28, %v1215_v22  ;;  %v1254_v60 = vmul.f32 %v2857_v49, %v1216_v6  ;;  %v1219_v25 = vmul.f32 %v1188_v9, %v2831_v55  ;;  %v1220_v57 = vmul.f32 %v1188_v9, %v2834_v26 }
 0x28d   : > { %1321 = vst [vmem:[%s2150_s0 + $0xc0] sm:$0xff] %v1289_v52  ;;  %v1293_v59 = vadd.f32 %v2859_v10, %v1255_v63  ;;  %v1294_v32 = vadd.f32 %v2861_v45, %v1256_v50 }
 0x28e   : > { %1322 = vst [vmem:[%s2150_s0 + $0xc8] sm:$0xff] %v1290_v35  ;;  %v1291_v19 = vadd.f32 %v2859_v10, %v1253_v29  ;;  %v1292_v1 = vadd.f32 %v2861_v45, %v1254_v60  ;;  %v1257_v12 = vmul.f32 %v2855_v28, %v1219_v25  ;;  %v1258_v11 = vmul.f32 %v2857_v49, %v1220_v57 }
 0x28f   : > { %1325 = vst [vmem:[%s2150_s0 + $0xe0] sm:$0xff] %v1293_v59 }
 0x290   : > { %1326 = vst [vmem:[%s2150_s0 + $0xe8] sm:$0xff] %v1294_v32  ;;  %v1295_v55 = vadd.f32 %v2859_v10, %v1257_v12  ;;  %v1296_v26 = vadd.f32 %v2861_v45, %v1258_v11 }
 0x291   : > { %1323 = vst [vmem:[%s2150_s0 + $0xd0] sm:$0xff] %v1291_v19 }
 0x292   : > { %1324 = vst [vmem:[%s2150_s0 + $0xd8] sm:$0xff] %v1292_v1 }
 0x293   : > { %1327 = vst [vmem:[%s2150_s0 + $0xf0] sm:$0xff] %v1295_v55 }
 0x294   : > { %1328 = vst [vmem:[%s2150_s0 + $0xf8] sm:$0xff] %v1296_v26 }
 0x295   : > { %1837 = shalt.err (!%p1834_p7)
}
 0x296   : > { %s1973_s0 = smov 256   ;;  %s1974_s14 = smov 16  }
 0x297   : > { %1548 = dma.vmem_to_hbm [thread:$0]  (%p2108_p13), %s1346_s9, 4096, %s1348_s29, %s1330_s25, %s1973_s0, %s1973_s0, %s1974_s14  }
 0x298 PF: > { %s3273_s24 = sld [smem:[#allocation23_spill]] }
 0x299   : > { %s3274_s30 = sld [smem:[#allocation16_spill]] }
 0x29e   : > { %p1559_p3 = scmp.ge.s32.totalorder %s3273_s24, 2 }
 0x29f   : > { %s1362_s26 = sand.u32 1, %s3274_s30  }
 0x2a0   : > { %p1555_p9 = pnand %p1559_p3, %p2113_p2  ;;  %s1363_s13 = scalar_lea.sflag [#allocation8], %s1362_s26 }
 0x2a2   : > { %p1556_p10 = pneg %p1555_p9 }
 0x2a4   : > { %1903 = dma.done.wait (%p1556_p10), %s1363_s13, 4096  }
 0x2a5   : > { %1905 = vsyncadd (%p1556_p10), %s1363_s13, 4294963200  ;;  %s31_s14 = sadd.s32 1, %s3273_s24   ;;  %s3276_s28 = sld [smem:[#allocation17_spill]] }
 0x2a6   : > { %p28_p8 = scmp.ge.s32.totalorder %s31_s14, 6   ;;  %s3277_s29 = sld [smem:[#allocation18_spill]] }
 0x2a7   : > { %s3278_s30 = sld [smem:[#allocation27_spill]] }
 0x2a8   : > { %s3279_s8 = sld [smem:[#allocation19_spill]] }
 0x2a9   : > { %s3280_s9 = sld [smem:[#allocation20_spill]] }
 0x2aa   : > { %s3281_s0 = sld [smem:[#allocation26_spill]]  ;;  %30 = sbr.rel (!%p28_p8) target bundleno = 16 (0x10), region = 158 }
 0x2ab   : > { %s3282_s10 = sld [smem:[#allocation21_spill]] }
 0x2ac   : > { %s3283_s11 = sld [smem:[#allocation22_spill]] }
 0x2ad   : > { %s3284_s12 = sld [smem:[#allocation24_spill]] }
 0x2ae   : > { %s3285_s13 = sld [smem:[#allocation25_spill]] }
 0x2af   :  { %1369 = vsyncpa [#allocation7], 1 }
 0x2b0   :  { %1371 = vsyncpa [#allocation7 + $0x1], 1 }
 0x2b1   :  { %1372 = vsyncpa [#allocation8], 1 }
 0x2b2   :  { %1374 = vsyncpa [#allocation8 + $0x1], 1 }
 0x2b3   :  { %1375 = vsyncmov [#allocation3] }
 0x2b6   :  { %s1376_s15 = vpop.sfrf %1375 }
 0x2b7   :  { %p1538_p13 = scmp.ne.s32.totalorder %s1376_s15, 0 }
 0x2b9   :  { %1380 = shalt.err (%p1538_p13)  }
 0x2ba   :  { %1382 = vsyncmov [#allocation3 + $0x1] }
 0x2bd   :  { %s1383_s22 = vpop.sfrf %1382 }
 0x2be   :  { %p1539_p2 = scmp.ne.s32.totalorder %s1383_s22, 0 }
 0x2c0   :  { %1387 = shalt.err (%p1539_p2)  }

</bundles_post_ra>
